<compile_context>
chip_gen: v6e
topology: v6e:2x2x1
jax: 0.10.0
libtpu: 0.0.40
codegen_flags: <defaults>
</compile_context>

<pallas_src>
import jax
import jax.numpy as jnp
from jax import lax
from jax.experimental import pallas as pl
from jax.experimental.pallas import tpu as pltpu

BN_EPS = 1e-5
LANE = 128


def _round_up(x, m):
    return ((x + m - 1) // m) * m


def _largest_divisor_leq(n, cap):
    best = 1
    for d in range(1, n + 1):
        if d > cap:
            break
        if n % d == 0:
            best = d
    return best


# ----------------------------------------------------------------------------
# Pallas kernels
# ----------------------------------------------------------------------------
def _make_conv_stats_kernel(*, fuse_bn_relu, h, w, cin, row_tile):
    """3x3 'SAME' conv on row stripes + BN batch-statistic accumulation.

    Grid: (batch, h // row_tile); batch 'parallel', row axis 'arbitrary' (the stats
    block and the activation scratch are carried across row stripes).

    Refs (in order):
      x_ref:     (1, h, w, cin)      input image, resident per batch element
                 (f32 raw input for layer 1, bf16 raw conv1 output for layer 2)
      ss_ref:    (8, cin) f32        [only when fuse_bn_relu] rows 0/1 = scale/shift
                 of the PREVIOUS layer's BN, fused (+ReLU) into the prologue.
      w_ref:     (9, kin, cpo) bf16  3x3 weights, K lane-padded; resident
      y_ref:     (1, row_tile*w, cpo) bf16  raw conv output rows for this stripe
      stats_ref: (1, 8, cpo) f32     row 0 = sum(y), row 1 = sum(y^2); resident
      act_ref:   (h+2, w+2, kin) f32 VMEM scratch: spatially padded, lane-padded
                 (and, for layer 2, BN+ReLU'd) activation image, built once per image.
    """

    def kernel(*refs):
        if fuse_bn_relu:
            x_ref, ss_ref, w_ref, y_ref, stats_ref, act_ref = refs
        else:
            x_ref, w_ref, y_ref, stats_ref, act_ref = refs
            ss_ref = None

        r = pl.program_id(1)
        cpo = y_ref.shape[-1]
        kin = act_ref.shape[-1]

        # ---- prologue: build padded activation scratch once per batch element ----
        @pl.when(r == 0)
        def _prep():
            act_ref[...] = jnp.zeros_like(act_ref)          # halo + lane padding = 0
            img = x_ref[0].astype(jnp.float32)              # (h, w, cin)
            if fuse_bn_relu:
                scale = ss_ref[0:1, :].reshape(1, 1, cin)
                shift = ss_ref[1:2, :].reshape(1, 1, cin)
                img = jnp.maximum(img * scale + shift, 0.0)  # fused BN+ReLU of layer 1
            act_ref[1:h + 1, 1:w + 1, 0:cin] = img
            stats_ref[...] = jnp.zeros_like(stats_ref)

        # ---- 9-tap 3x3 conv: bf16 MXU matmuls, f32 accumulation ------------------
        row0 = pl.multiple_of(r * row_tile, row_tile)
        acc = jnp.zeros((row_tile * w, cpo), jnp.float32)
        for dy in range(3):
            for dx in range(3):
                win = act_ref[pl.ds(row0 + dy, row_tile), dx:dx + w, :]   # (tr, w, kin)
                patch = win.reshape(row_tile * w, kin).astype(jnp.bfloat16)
                acc = acc + jnp.dot(patch, w_ref[3 * dy + dx],
                                    preferred_element_type=jnp.float32)

        # Raw (pre-BN) conv output, stored bf16.  No conv bias: a per-channel bias
        # is cancelled exactly by batch-statistic (training-mode) BatchNorm.
        y_ref[...] = acc.reshape(1, row_tile * w, cpo).astype(y_ref.dtype)

        # BN sufficient statistics (f32), accumulated across row stripes.
        stats_ref[0:1, 0:1, :] += jnp.sum(acc, axis=0, keepdims=True).reshape(1, 1, cpo)
        stats_ref[0:1, 1:2, :] += jnp.sum(acc * acc, axis=0,
                                          keepdims=True).reshape(1, 1, cpo)

    return kernel


def bn_relu_pool_kernel(y_ref, ss_ref, o_ref):
    """BN (scale/shift) + ReLU + fused 2x2/stride-2 maxpool.

      y_ref: (2*R, W, C) bf16 raw conv2 output rows (natural lane-dense layout)
      ss_ref: (8, C) f32, rows 0/1 = scale/shift
      o_ref: (R, W//2, C) f32
    """
    r2, w_sp, c = y_ref.shape
    scale = ss_ref[0:1, :].reshape(1, 1, c)
    shift = ss_ref[1:2, :].reshape(1, 1, c)
    a = jnp.maximum(y_ref[...].astype(jnp.float32) * scale + shift, 0.0)
    m = a.reshape(r2 // 2, 2, w_sp, c).max(axis=1)                  # row-pair max
    o_ref[...] = m.reshape(r2 // 2, w_sp // 2, 2, c).max(axis=2)    # col-pair max


# ----------------------------------------------------------------------------
# One conv pass (+ optional fused BN/ReLU of the previous layer in its prologue)
# ----------------------------------------------------------------------------
def _conv_stats_pass(x_nhwc, w_hwio, ss, *, row_tile):
    n, h, w, c_act = x_nhwc.shape
    kh, kw, c_w_in, co = w_hwio.shape
    assert (kh, kw) == (3, 3) and c_w_in <= c_act
    rt = _largest_divisor_leq(h, row_tile)
    assert (rt * w) % 8 == 0

    kin = _round_up(c_act, LANE)          # contraction width (lane padding, VMEM only)
    cpo = _round_up(co, LANE)

    w9 = jnp.zeros((9, kin, cpo), jnp.float32)
    w9 = w9.at[:, :c_w_in, :co].set(w_hwio.reshape(9, c_w_in, co)).astype(jnp.bfloat16)

    fuse = ss is not None
    kernel = _make_conv_stats_kernel(fuse_bn_relu=fuse, h=h, w=w, cin=c_act, row_tile=rt)

    in_specs = [pl.BlockSpec((1, h, w, c_act), lambda i, r: (i, 0, 0, 0))]
    inputs = [x_nhwc]
    if fuse:
        in_specs.append(pl.BlockSpec((8, c_act), lambda i, r: (0, 0)))
        inputs.append(ss)
    in_specs.append(pl.BlockSpec((9, kin, cpo), lambda i, r: (0, 0, 0)))
    inputs.append(w9)

    y_raw, stats = pl.pallas_call(
        kernel,
        out_shape=(jax.ShapeDtypeStruct((n, h * w, cpo), jnp.bfloat16),
                   jax.ShapeDtypeStruct((n, 8, cpo), jnp.float32)),
        grid=(n, h // rt),
        in_specs=in_specs,
        out_specs=(pl.BlockSpec((1, rt * w, cpo), lambda i, r: (i, r, 0)),
                   pl.BlockSpec((1, 8, cpo), lambda i, r: (i, 0, 0))),
        scratch_shapes=[pltpu.VMEM((h + 2, w + 2, kin), jnp.float32)],
        # Batch axis across cores ("parallel"); row axis carries the stat accumulator
        # and the activation scratch, so it stays sequential ("arbitrary").
        # TODO(synk): for a v7x-only build, use pltpu.CORE_PARALLEL on the batch axis
        #             and a halo row-stripe input block for large (e.g. 224x224) images.
        compiler_params=pltpu.CompilerParams(
            dimension_semantics=("parallel", "arbitrary")),
    )(*inputs)
    return y_raw, stats, cpo


def _bn_scale_shift(stats, gamma, beta, m_total):
    """Per-channel affine (scale, shift) implementing training-mode BatchNorm."""
    cpo = stats.shape[-1]
    s = jnp.sum(stats[:, 0, :], axis=0)
    q = jnp.sum(stats[:, 1, :], axis=0)
    mean = s / m_total
    # NOTE: E[y^2] - E[y]^2 in f32 can lose precision for large-|mean| channels
    # (clamped to >= 0 so never NaN).  A shifted-sums variant is the safer general fix.
    var = jnp.maximum(q / m_total - mean * mean, 0.0)
    co = gamma.shape[0]
    g = jnp.zeros((cpo,), jnp.float32).at[:co].set(gamma.astype(jnp.float32))
    b = jnp.zeros((cpo,), jnp.float32).at[:co].set(beta.astype(jnp.float32))
    scale = g * lax.rsqrt(var + BN_EPS)
    shift = b - mean * scale
    return jnp.zeros((8, cpo), jnp.float32).at[0].set(scale).at[1].set(shift)


def _bn_relu_pool(y_raw, ss, n, h, w):
    cpo = y_raw.shape[-1]
    ho, wo = h // 2, w // 2
    y3 = y_raw.reshape(n * h, w, cpo)          # metadata-only reshape
    rows_out = n * ho
    # Mem-bound pass: large blocks (up to 512 input rows) to approach the HBM roofline.
    r_blk = _largest_divisor_leq(rows_out, 256)
    out = pl.pallas_call(
        bn_relu_pool_kernel,
        out_shape=jax.ShapeDtypeStruct((rows_out, wo, cpo), jnp.float32),
        grid=(rows_out // r_blk,),
        in_specs=[pl.BlockSpec((2 * r_blk, w, cpo), lambda i: (i, 0, 0)),
                  pl.BlockSpec((8, cpo), lambda i: (0, 0))],
        out_specs=pl.BlockSpec((r_blk, wo, cpo), lambda i: (i, 0, 0)),
        compiler_params=pltpu.CompilerParams(dimension_semantics=("parallel",)),
    )(y3, ss)
    return out.reshape(n, ho, wo, cpo)


# ----------------------------------------------------------------------------
# Full LocalBlock forward (NCHW in / NCHW out)
# ----------------------------------------------------------------------------
def local_block(x_nchw, w1, b1, g1, be1, w2, b2, g2, be2, *, row_tile=8):
    """w1: (3,3,Cin,Cout) HWIO, w2: (3,3,Cout,Cout) HWIO.

    b1/b2 are accepted for parameter parity with nn.Conv2d but intentionally unused:
    a per-channel bias added before batch-statistic (training-mode) BatchNorm is
    exactly cancelled by the mean subtraction (zero effect on the forward output).
    """
    del b1, b2
    n, cin, h, w = x_nchw.shape
    assert h % 2 == 0 and w % 2 == 0
    cout = w1.shape[-1]
    x = jnp.transpose(x_nchw, (0, 2, 3, 1))                 # NHWC, real channels

    # pass 1: conv1 + BN1 sufficient statistics
    y1_raw, stats1, cpo1 = _conv_stats_pass(x, w1, None, row_tile=row_tile)
    ss1 = _bn_scale_shift(stats1, g1, be1, n * h * w)

    # pass 2: BN1+ReLU fused into conv2's prologue; conv2 + BN2 sufficient statistics
    y2_raw, stats2, _ = _conv_stats_pass(
        y1_raw.reshape(n, h, w, cpo1), w2, ss1, row_tile=row_tile)
    ss2 = _bn_scale_shift(stats2, g2, be2, n * h * w)

    # pass 3: BN2 + ReLU + fused 2x2 maxpool
    y = _bn_relu_pool(y2_raw, ss2, n, h, w)                 # (n, h/2, w/2, cpo2) f32
    return jnp.transpose(y[..., :cout], (0, 3, 1, 2))       # NCHW, real channels


# ----------------------------------------------------------------------------
# Pure-JAX reference (mirrors the PyTorch forward, training-mode BN, f32)
# ----------------------------------------------------------------------------
def reference(x_nchw, w1, b1, g1, be1, w2, b2, g2, be2):
    x = jnp.transpose(x_nchw, (0, 2, 3, 1))
    dn = ('NHWC', 'HWIO', 'NHWC')

    def conv_bn_relu(inp, w, b, g, be):
        y = lax.conv_general_dilated(inp, w, (1, 1), 'SAME', dimension_numbers=dn,
                                     precision=lax.Precision.HIGHEST) + b
        mean = jnp.mean(y, axis=(0, 1, 2))
        var = jnp.var(y, axis=(0, 1, 2))
        y = (y - mean) * lax.rsqrt(var + BN_EPS) * g + be
        return jnp.maximum(y, 0.0)

    y = conv_bn_relu(x, w1, b1, g1, be1)
    y = conv_bn_relu(y, w2, b2, g2, be2)
    n, h, w, c = y.shape
    y = y.reshape(n, h // 2, 2, w // 2, 2, c).max(axis=(2, 4))
    return jnp.transpose(y, (0, 3, 1, 2))


# ----------------------------------------------------------------------------
if __name__ == "__main__":
    N, Cin, Cout, H, W = 2, 4, 8, 16, 16

    key = jax.random.PRNGKey(0)
    k0, k1, k2, k3, k4 = jax.random.split(key, 5)

    x = jax.random.normal(k0, (N, Cin, H, W), jnp.float32)
    # Deterministic synthetic parameters (HWIO conv weights; BN = PyTorch init).
    w1 = jax.random.normal(k1, (3, 3, Cin, Cout), jnp.float32) * 0.1
    b1 = jax.random.normal(k2, (Cout,), jnp.float32) * 0.1
    w2 = jax.random.normal(k3, (3, 3, Cout, Cout), jnp.float32) * 0.1
    b2 = jax.random.normal(k4, (Cout,), jnp.float32) * 0.1
    g1 = jnp.ones((Cout,), jnp.float32)
    be1 = jnp.zeros((Cout,), jnp.float32)
    g2 = jnp.ones((Cout,), jnp.float32)
    be2 = jnp.zeros((Cout,), jnp.float32)

    out = jax.block_until_ready(local_block(x, w1, b1, g1, be1, w2, b2, g2, be2))
    ref = jax.block_until_ready(reference(x, w1, b1, g1, be1, w2, b2, g2, be2))

    assert out.shape == (N, Cout, H // 2, W // 2), out.shape
    assert bool(jnp.all(out >= 0.0))  # post-ReLU + maxpool outputs are non-negative

    err_max = float(jnp.max(jnp.abs(out - ref)))
    err_mean = float(jnp.mean(jnp.abs(out - ref)))
    # bf16 MXU operands + bf16 inter-pass feature maps (per perf guidance) with f32
    # accumulation/statistics bound the error; structural bugs would be O(1).
    assert err_max < 8e-2, (err_max, err_mean)
    assert err_mean < 2e-2, (err_max, err_mean)

    print("KERNEL_OK")
</pallas_src>

<mosaic_0001>
module attributes {stable_mosaic.version = 11 : i64} {
  func.func @kernel(%arg0: i32, %arg1: i32, %arg2: memref<1x16x16x4xf32, #tpu.memory_space<vmem>>, %arg3: memref<9x128x128xbf16, #tpu.memory_space<vmem>>, %arg4: memref<1x128x128xbf16, #tpu.memory_space<vmem>>, %arg5: memref<1x8x128xf32, #tpu.memory_space<vmem>>, %arg6: memref<18x18x128xf32, #tpu.memory_space<vmem>>) attributes {dimension_semantics = [#tpu.dimension_semantics<parallel>, #tpu.dimension_semantics<arbitrary>], iteration_bounds = array<i64: 2, 2>, scalar_prefetch = 0 : i64, scratch_operands = 1 : i64, tpu.core_type = #tpu.core_type<tc>, window_params = [{transform_indices = @transform_0, window_bounds = array<i64: 1, 16, 16, 4>}, {pipeline_mode = #tpu.pipeline_mode<synchronous>, transform_indices = @transform_1, window_bounds = array<i64: 9, 128, 128>}, {transform_indices = @transform_2, window_bounds = array<i64: 1, 128, 128>}, {transform_indices = @transform_3, window_bounds = array<i64: 1, 8, 128>}]} {
    %c0_i32 = arith.constant 0 : i32
    %0 = arith.cmpi eq, %arg1, %c0_i32 : i32
    %1 = arith.extui %0 : i1 to i32
    %c0_i32_0 = arith.constant 0 : i32
    %2 = arith.cmpi ne, %1, %c0_i32_0 : i32
    scf.if %2 {
      %cst_70 = arith.constant 0.000000e+00 : f32
      %103 = vector.broadcast %cst_70 : f32 to vector<18x18x128xf32>
      %c0_71 = arith.constant 0 : index
      %c0_72 = arith.constant 0 : index
      %c0_73 = arith.constant 0 : index
      %104 = vector.load %arg6[%c0_71, %c0_72, %c0_73] : memref<18x18x128xf32, #tpu.memory_space<vmem>>, vector<18x18x128xf32>
      tpu.vector_store %arg6[%c0_71, %c0_72, %c0_73], %103 {strides = array<i32>} : memref<18x18x128xf32, #tpu.memory_space<vmem>>, vector<18x18x128xf32>,
      %c0_74 = arith.constant 0 : index
      %c0_75 = arith.constant 0 : index
      %c0_76 = arith.constant 0 : index
      %c0_77 = arith.constant 0 : index
      %105 = vector.load %arg2[%c0_74, %c0_75, %c0_76, %c0_77] : memref<1x16x16x4xf32, #tpu.memory_space<vmem>>, vector<1x16x16x4xf32>
      %106 = vector.shape_cast %105 : vector<1x16x16x4xf32> to vector<16x16x4xf32>
      %c1_78 = arith.constant 1 : index
      %c1_79 = arith.constant 1 : index
      %c0_80 = arith.constant 0 : index
      %107 = vector.load %arg6[%c1_78, %c1_79, %c0_80] : memref<18x18x128xf32, #tpu.memory_space<vmem>>, vector<16x16x4xf32>
      tpu.vector_store %arg6[%c1_78, %c1_79, %c0_80], %106 {strides = array<i32>} : memref<18x18x128xf32, #tpu.memory_space<vmem>>, vector<16x16x4xf32>,
      %cst_81 = arith.constant 0.000000e+00 : f32
      %108 = vector.broadcast %cst_81 : f32 to vector<1x8x128xf32>
      %c0_82 = arith.constant 0 : index
      %c0_83 = arith.constant 0 : index
      %c0_84 = arith.constant 0 : index
      %109 = vector.load %arg5[%c0_82, %c0_83, %c0_84] : memref<1x8x128xf32, #tpu.memory_space<vmem>>, vector<1x8x128xf32>
      tpu.vector_store %arg5[%c0_82, %c0_83, %c0_84], %108 {strides = array<i32>} : memref<1x8x128xf32, #tpu.memory_space<vmem>>, vector<1x8x128xf32>,
    } else {
    }
    %c8_i32 = arith.constant 8 : i32
    %3 = arith.muli %arg1, %c8_i32 : i32
    %4 = tpu.assume_multiple %3, 8 : i32
    %cst = arith.constant 0.000000e+00 : f32
    %5 = vector.broadcast %cst : f32 to vector<128x128xf32>
    %c0_i32_1 = arith.constant 0 : i32
    %6 = arith.addi %4, %c0_i32_1 : i32
    %7 = arith.index_cast %6 : i32 to index
    %c0 = arith.constant 0 : index
    %c0_2 = arith.constant 0 : index
    %8 = vector.load %arg6[%7, %c0, %c0_2] : memref<18x18x128xf32, #tpu.memory_space<vmem>>, vector<8x16x128xf32>
    %9 = vector.shape_cast %8 : vector<8x16x128xf32> to vector<128x128xf32>
    %10 = arith.truncf %9 : vector<128x128xf32> to vector<128x128xbf16>
    %c0_3 = arith.constant 0 : index
    %c0_4 = arith.constant 0 : index
    %c0_5 = arith.constant 0 : index
    %11 = vector.load %arg3[%c0_3, %c0_4, %c0_5] : memref<9x128x128xbf16, #tpu.memory_space<vmem>>, vector<1x128x128xbf16>
    %12 = vector.shape_cast %11 : vector<1x128x128xbf16> to vector<128x128xbf16>
    %cst_6 = arith.constant dense<0.000000e+00> : vector<128x128xf32>
    %13 = tpu.matmul %10, %12, %cst_6 {dimension_numbers = #tpu.dot_dimension_numbers<[1], [0], [0], [1], [0, 0, 1, 1], [], []>} : vector<128x128xbf16>, vector<128x128xbf16>, vector<128x128xf32> -> vector<128x128xf32>
    %14 = arith.addf %5, %13 : vector<128x128xf32>
    %c0_i32_7 = arith.constant 0 : i32
    %15 = arith.addi %4, %c0_i32_7 : i32
    %16 = arith.index_cast %15 : i32 to index
    %c1 = arith.constant 1 : index
    %c0_8 = arith.constant 0 : index
    %17 = vector.load %arg6[%16, %c1, %c0_8] : memref<18x18x128xf32, #tpu.memory_space<vmem>>, vector<8x16x128xf32>
    %18 = vector.shape_cast %17 : vector<8x16x128xf32> to vector<128x128xf32>
    %19 = arith.truncf %18 : vector<128x128xf32> to vector<128x128xbf16>
    %c1_9 = arith.constant 1 : index
    %c0_10 = arith.constant 0 : index
    %c0_11 = arith.constant 0 : index
    %20 = vector.load %arg3[%c1_9, %c0_10, %c0_11] : memref<9x128x128xbf16, #tpu.memory_space<vmem>>, vector<1x128x128xbf16>
    %21 = vector.shape_cast %20 : vector<1x128x128xbf16> to vector<128x128xbf16>
    %cst_12 = arith.constant dense<0.000000e+00> : vector<128x128xf32>
    %22 = tpu.matmul %19, %21, %cst_12 {dimension_numbers = #tpu.dot_dimension_numbers<[1], [0], [0], [1], [0, 0, 1, 1], [], []>} : vector<128x128xbf16>, vector<128x128xbf16>, vector<128x128xf32> -> vector<128x128xf32>
    %23 = arith.addf %14, %22 : vector<128x128xf32>
    %c0_i32_13 = arith.constant 0 : i32
    %24 = arith.addi %4, %c0_i32_13 : i32
    %25 = arith.index_cast %24 : i32 to index
    %c2 = arith.constant 2 : index
    %c0_14 = arith.constant 0 : index
    %26 = vector.load %arg6[%25, %c2, %c0_14] : memref<18x18x128xf32, #tpu.memory_space<vmem>>, vector<8x16x128xf32>
    %27 = vector.shape_cast %26 : vector<8x16x128xf32> to vector<128x128xf32>
    %28 = arith.truncf %27 : vector<128x128xf32> to vector<128x128xbf16>
    %c2_15 = arith.constant 2 : index
    %c0_16 = arith.constant 0 : index
    %c0_17 = arith.constant 0 : index
    %29 = vector.load %arg3[%c2_15, %c0_16, %c0_17] : memref<9x128x128xbf16, #tpu.memory_space<vmem>>, vector<1x128x128xbf16>
    %30 = vector.shape_cast %29 : vector<1x128x128xbf16> to vector<128x128xbf16>
    %cst_18 = arith.constant dense<0.000000e+00> : vector<128x128xf32>
    %31 = tpu.matmul %28, %30, %cst_18 {dimension_numbers = #tpu.dot_dimension_numbers<[1], [0], [0], [1], [0, 0, 1, 1], [], []>} : vector<128x128xbf16>, vector<128x128xbf16>, vector<128x128xf32> -> vector<128x128xf32>
    %32 = arith.addf %23, %31 : vector<128x128xf32>
    %c1_i32 = arith.constant 1 : i32
    %33 = arith.addi %4, %c1_i32 : i32
    %34 = arith.index_cast %33 : i32 to index
    %c0_19 = arith.constant 0 : index
    %c0_20 = arith.constant 0 : index
    %35 = vector.load %arg6[%34, %c0_19, %c0_20] : memref<18x18x128xf32, #tpu.memory_space<vmem>>, vector<8x16x128xf32>
    %36 = vector.shape_cast %35 : vector<8x16x128xf32> to vector<128x128xf32>
    %37 = arith.truncf %36 : vector<128x128xf32> to vector<128x128xbf16>
    %c3 = arith.constant 3 : index
    %c0_21 = arith.constant 0 : index
    %c0_22 = arith.constant 0 : index
    %38 = vector.load %arg3[%c3, %c0_21, %c0_22] : memref<9x128x128xbf16, #tpu.memory_space<vmem>>, vector<1x128x128xbf16>
    %39 = vector.shape_cast %38 : vector<1x128x128xbf16> to vector<128x128xbf16>
    %cst_23 = arith.constant dense<0.000000e+00> : vector<128x128xf32>
    %40 = tpu.matmul %37, %39, %cst_23 {dimension_numbers = #tpu.dot_dimension_numbers<[1], [0], [0], [1], [0, 0, 1, 1], [], []>} : vector<128x128xbf16>, vector<128x128xbf16>, vector<128x128xf32> -> vector<128x128xf32>
    %41 = arith.addf %32, %40 : vector<128x128xf32>
    %c1_i32_24 = arith.constant 1 : i32
    %42 = arith.addi %4, %c1_i32_24 : i32
    %43 = arith.index_cast %42 : i32 to index
    %c1_25 = arith.constant 1 : index
    %c0_26 = arith.constant 0 : index
    %44 = vector.load %arg6[%43, %c1_25, %c0_26] : memref<18x18x128xf32, #tpu.memory_space<vmem>>, vector<8x16x128xf32>
    %45 = vector.shape_cast %44 : vector<8x16x128xf32> to vector<128x128xf32>
    %46 = arith.truncf %45 : vector<128x128xf32> to vector<128x128xbf16>
    %c4 = arith.constant 4 : index
    %c0_27 = arith.constant 0 : index
    %c0_28 = arith.constant 0 : index
    %47 = vector.load %arg3[%c4, %c0_27, %c0_28] : memref<9x128x128xbf16, #tpu.memory_space<vmem>>, vector<1x128x128xbf16>
    %48 = vector.shape_cast %47 : vector<1x128x128xbf16> to vector<128x128xbf16>
    %cst_29 = arith.constant dense<0.000000e+00> : vector<128x128xf32>
    %49 = tpu.matmul %46, %48, %cst_29 {dimension_numbers = #tpu.dot_dimension_numbers<[1], [0], [0], [1], [0, 0, 1, 1], [], []>} : vector<128x128xbf16>, vector<128x128xbf16>, vector<128x128xf32> -> vector<128x128xf32>
    %50 = arith.addf %41, %49 : vector<128x128xf32>
    %c1_i32_30 = arith.constant 1 : i32
    %51 = arith.addi %4, %c1_i32_30 : i32
    %52 = arith.index_cast %51 : i32 to index
    %c2_31 = arith.constant 2 : index
    %c0_32 = arith.constant 0 : index
    %53 = vector.load %arg6[%52, %c2_31, %c0_32] : memref<18x18x128xf32, #tpu.memory_space<vmem>>, vector<8x16x128xf32>
    %54 = vector.shape_cast %53 : vector<8x16x128xf32> to vector<128x128xf32>
    %55 = arith.truncf %54 : vector<128x128xf32> to vector<128x128xbf16>
    %c5 = arith.constant 5 : index
    %c0_33 = arith.constant 0 : index
    %c0_34 = arith.constant 0 : index
    %56 = vector.load %arg3[%c5, %c0_33, %c0_34] : memref<9x128x128xbf16, #tpu.memory_space<vmem>>, vector<1x128x128xbf16>
    %57 = vector.shape_cast %56 : vector<1x128x128xbf16> to vector<128x128xbf16>
    %cst_35 = arith.constant dense<0.000000e+00> : vector<128x128xf32>
    %58 = tpu.matmul %55, %57, %cst_35 {dimension_numbers = #tpu.dot_dimension_numbers<[1], [0], [0], [1], [0, 0, 1, 1], [], []>} : vector<128x128xbf16>, vector<128x128xbf16>, vector<128x128xf32> -> vector<128x128xf32>
    %59 = arith.addf %50, %58 : vector<128x128xf32>
    %c2_i32 = arith.constant 2 : i32
    %60 = arith.addi %4, %c2_i32 : i32
    %61 = arith.index_cast %60 : i32 to index
    %c0_36 = arith.constant 0 : index
    %c0_37 = arith.constant 0 : index
    %62 = vector.load %arg6[%61, %c0_36, %c0_37] : memref<18x18x128xf32, #tpu.memory_space<vmem>>, vector<8x16x128xf32>
    %63 = vector.shape_cast %62 : vector<8x16x128xf32> to vector<128x128xf32>
    %64 = arith.truncf %63 : vector<128x128xf32> to vector<128x128xbf16>
    %c6 = arith.constant 6 : index
    %c0_38 = arith.constant 0 : index
    %c0_39 = arith.constant 0 : index
    %65 = vector.load %arg3[%c6, %c0_38, %c0_39] : memref<9x128x128xbf16, #tpu.memory_space<vmem>>, vector<1x128x128xbf16>
    %66 = vector.shape_cast %65 : vector<1x128x128xbf16> to vector<128x128xbf16>
    %cst_40 = arith.constant dense<0.000000e+00> : vector<128x128xf32>
    %67 = tpu.matmul %64, %66, %cst_40 {dimension_numbers = #tpu.dot_dimension_numbers<[1], [0], [0], [1], [0, 0, 1, 1], [], []>} : vector<128x128xbf16>, vector<128x128xbf16>, vector<128x128xf32> -> vector<128x128xf32>
    %68 = arith.addf %59, %67 : vector<128x128xf32>
    %c2_i32_41 = arith.constant 2 : i32
    %69 = arith.addi %4, %c2_i32_41 : i32
    %70 = arith.index_cast %69 : i32 to index
    %c1_42 = arith.constant 1 : index
    %c0_43 = arith.constant 0 : index
    %71 = vector.load %arg6[%70, %c1_42, %c0_43] : memref<18x18x128xf32, #tpu.memory_space<vmem>>, vector<8x16x128xf32>
    %72 = vector.shape_cast %71 : vector<8x16x128xf32> to vector<128x128xf32>
    %73 = arith.truncf %72 : vector<128x128xf32> to vector<128x128xbf16>
    %c7 = arith.constant 7 : index
    %c0_44 = arith.constant 0 : index
    %c0_45 = arith.constant 0 : index
    %74 = vector.load %arg3[%c7, %c0_44, %c0_45] : memref<9x128x128xbf16, #tpu.memory_space<vmem>>, vector<1x128x128xbf16>
    %75 = vector.shape_cast %74 : vector<1x128x128xbf16> to vector<128x128xbf16>
    %cst_46 = arith.constant dense<0.000000e+00> : vector<128x128xf32>
    %76 = tpu.matmul %73, %75, %cst_46 {dimension_numbers = #tpu.dot_dimension_numbers<[1], [0], [0], [1], [0, 0, 1, 1], [], []>} : vector<128x128xbf16>, vector<128x128xbf16>, vector<128x128xf32> -> vector<128x128xf32>
    %77 = arith.addf %68, %76 : vector<128x128xf32>
    %c2_i32_47 = arith.constant 2 : i32
    %78 = arith.addi %4, %c2_i32_47 : i32
    %79 = arith.index_cast %78 : i32 to index
    %c2_48 = arith.constant 2 : index
    %c0_49 = arith.constant 0 : index
    %80 = vector.load %arg6[%79, %c2_48, %c0_49] : memref<18x18x128xf32, #tpu.memory_space<vmem>>, vector<8x16x128xf32>
    %81 = vector.shape_cast %80 : vector<8x16x128xf32> to vector<128x128xf32>
    %82 = arith.truncf %81 : vector<128x128xf32> to vector<128x128xbf16>
    %c8 = arith.constant 8 : index
    %c0_50 = arith.constant 0 : index
    %c0_51 = arith.constant 0 : index
    %83 = vector.load %arg3[%c8, %c0_50, %c0_51] : memref<9x128x128xbf16, #tpu.memory_space<vmem>>, vector<1x128x128xbf16>
    %84 = vector.shape_cast %83 : vector<1x128x128xbf16> to vector<128x128xbf16>
    %cst_52 = arith.constant dense<0.000000e+00> : vector<128x128xf32>
    %85 = tpu.matmul %82, %84, %cst_52 {dimension_numbers = #tpu.dot_dimension_numbers<[1], [0], [0], [1], [0, 0, 1, 1], [], []>} : vector<128x128xbf16>, vector<128x128xbf16>, vector<128x128xf32> -> vector<128x128xf32>
    %86 = arith.addf %77, %85 : vector<128x128xf32>
    %87 = vector.shape_cast %86 : vector<128x128xf32> to vector<1x128x128xf32>
    %88 = arith.truncf %87 : vector<1x128x128xf32> to vector<1x128x128xbf16>
    %c0_53 = arith.constant 0 : index
    %c0_54 = arith.constant 0 : index
    %c0_55 = arith.constant 0 : index
    %89 = vector.load %arg4[%c0_53, %c0_54, %c0_55] : memref<1x128x128xbf16, #tpu.memory_space<vmem>>, vector<1x128x128xbf16>
    tpu.vector_store %arg4[%c0_53, %c0_54, %c0_55], %88 {strides = array<i32>} : memref<1x128x128xbf16, #tpu.memory_space<vmem>>, vector<1x128x128xbf16>,
    %c0_56 = arith.constant 0 : index
    %c0_57 = arith.constant 0 : index
    %c0_58 = arith.constant 0 : index
    %90 = vector.load %arg5[%c0_56, %c0_57, %c0_58] : memref<1x8x128xf32, #tpu.memory_space<vmem>>, vector<1x1x128xf32>
    %cst_59 = arith.constant dense<0.000000e+00> : vector<128xf32>
    %91 = vector.multi_reduction <add>, %86, %cst_59 [0] : vector<128x128xf32> to vector<128xf32>
    %92 = vector.shape_cast %91 : vector<128xf32> to vector<1x128xf32>
    %93 = vector.shape_cast %92 : vector<1x128xf32> to vector<1x1x128xf32>
    %94 = arith.addf %90, %93 : vector<1x1x128xf32>
    %c0_60 = arith.constant 0 : index
    %c0_61 = arith.constant 0 : index
    %c0_62 = arith.constant 0 : index
    %95 = vector.load %arg5[%c0_60, %c0_61, %c0_62] : memref<1x8x128xf32, #tpu.memory_space<vmem>>, vector<1x1x128xf32>
    tpu.vector_store %arg5[%c0_60, %c0_61, %c0_62], %94 {strides = array<i32>} : memref<1x8x128xf32, #tpu.memory_space<vmem>>, vector<1x1x128xf32>,
    %c0_63 = arith.constant 0 : index
    %c1_64 = arith.constant 1 : index
    %c0_65 = arith.constant 0 : index
    %96 = vector.load %arg5[%c0_63, %c1_64, %c0_65] : memref<1x8x128xf32, #tpu.memory_space<vmem>>, vector<1x1x128xf32>
    %97 = arith.mulf %86, %86 : vector<128x128xf32>
    %cst_66 = arith.constant dense<0.000000e+00> : vector<128xf32>
    %98 = vector.multi_reduction <add>, %97, %cst_66 [0] : vector<128x128xf32> to vector<128xf32>
    %99 = vector.shape_cast %98 : vector<128xf32> to vector<1x128xf32>
    %100 = vector.shape_cast %99 : vector<1x128xf32> to vector<1x1x128xf32>
    %101 = arith.addf %96, %100 : vector<1x1x128xf32>
    %c0_67 = arith.constant 0 : index
    %c1_68 = arith.constant 1 : index
    %c0_69 = arith.constant 0 : index
    %102 = vector.load %arg5[%c0_67, %c1_68, %c0_69] : memref<1x8x128xf32, #tpu.memory_space<vmem>>, vector<1x1x128xf32>
    tpu.vector_store %arg5[%c0_67, %c1_68, %c0_69], %101 {strides = array<i32>} : memref<1x8x128xf32, #tpu.memory_space<vmem>>, vector<1x1x128xf32>,
    return
  }
  func.func @transform_0(%arg0: i32, %arg1: i32) -> (i32, i32, i32, i32) {
    %c0_i32 = arith.constant 0 : i32
    %c0_i32_0 = arith.constant 0 : i32
    %c0_i32_1 = arith.constant 0 : i32
    %c0_i32_2 = arith.constant 0 : i32
    return %arg0, %c0_i32, %c0_i32_0, %c0_i32_1 : i32, i32, i32, i32
  }
  func.func @transform_1(%arg0: i32, %arg1: i32) -> (i32, i32, i32) {
    %c0_i32 = arith.constant 0 : i32
    %c0_i32_0 = arith.constant 0 : i32
    %c0_i32_1 = arith.constant 0 : i32
    %c0_i32_2 = arith.constant 0 : i32
    return %c0_i32, %c0_i32_0, %c0_i32_1 : i32, i32, i32
  }
  func.func @transform_2(%arg0: i32, %arg1: i32) -> (i32, i32, i32) {
    %c0_i32 = arith.constant 0 : i32
    %c0_i32_0 = arith.constant 0 : i32
    return %arg0, %arg1, %c0_i32 : i32, i32, i32
  }
  func.func @transform_3(%arg0: i32, %arg1: i32) -> (i32, i32, i32) {
    %c0_i32 = arith.constant 0 : i32
    %c0_i32_0 = arith.constant 0 : i32
    %c0_i32_1 = arith.constant 0 : i32
    return %arg0, %c0_i32, %c0_i32_0 : i32, i32, i32
  }
}

</mosaic_0001>

<bundles_post_ra>
// kernel: tpu_custom_call.1
= control target key start
LH: loop header
LB: loop body
LE: loop exit
PB: predicated region body
PF: predicated region fallthrough
CT: control target
= control target key end

     0   :  { %s4498_s0 = inlined_call_operand.vmem [shape: f32[2,16,16,4], index: 0, kind: input, shape index: {}]   ;;  %s4499_s1 = inlined_call_operand.vmem [shape: bf16[9,128,128], index: 1, kind: input, shape index: {}]   ;;  %s4500_s2 = inlined_call_operand.hbm [shape: bf16[2,256,128], index: 2, kind: output, shape index: {0}]   ;;  %s4501_s3 = inlined_call_operand.hbm [shape: f32[2,8,128], index: 3, kind: output, shape index: {1}]  }
   0x1   :  { %4507 = sst [smem:[#allocation30_spill]] %s4498_s0 }
   0x2   :  { %9 = vsyncpa [#allocation4], 0 }
   0x3   :  { %11 = vsyncpa [#allocation4 + $0x1], 0 }
   0x4   :  { %12 = vsyncpa [#allocation6], 0 }
   0x5   :  { %14 = vsyncpa [#allocation6 + $0x1], 0  ;;  %s3607_s12 = smov 0   ;;  %s3609_s13 = smov 0  }
   0x6   :  { %s3611_s14 = smov 0   ;;  %s3613_s15 = smov 0  }
   0x7   :  { %s3615_s16 = smov 0   ;;  %s3617_s17 = smov 0  }
   0x8   :  { %s3619_s18 = smov 0   ;;  %s3621_s19 = smov 0  }
   0x9   :  { %s3623_s20 = smov 0   ;;  %s3625_s21 = smov 0  }
   0xa   :  { %s3627_s22 = smov 0  }
   0xb LB: > { %4508 = sst [smem:[#allocation9_spill]] %s3576_s21  ;;  %s2411_s23 = sadd.s32 4294967295, %s3580_s22   ;;  %s3580_s22 = sphi %s3627_s22, %s20_s22   ;;  %s3576_s21 = sphi %s3625_s21, %s4559_s21   ;;  %s3572_s20 = sphi %s3623_s20, %s4567_s20   ;;  %s3568_s19 = sphi %s3621_s19, %s4557_s19   ;;  %s3564_s18 = sphi %s3619_s18, %s4566_s18   ;;  %s3560_s17 = sphi %s3617_s17, %s4565_s17   ;;  %s3556_s16 = sphi %s3615_s16, %s4564_s16   ;;  %s3552_s15 = sphi %s3613_s15, %s4563_s15   ;;  %s3548_s14 = sphi %s3611_s14, %s4562_s14   ;;  %s3544_s13 = sphi %s3609_s13, %s4561_s13   ;;  %s3540_s12 = sphi %s3607_s12, %s4560_s12  }
   0xc   : > { %s2412_s24 = sadd.s32 4294967294, %s3580_s22   ;;  %s29_s25 = sadd.s32 1, %s3572_s20 }
   0xd   : > { %s32_s26 = sadd.s32 1, %s3576_s21  ;;  %p30_p0 = scmp.ge.s32.totalorder %s29_s25, 2 }
   0xe   : > { %s88_s27 = sadd.s32 1, %s3560_s17  ;;  %p98_p1 = scmp.ne.s32.totalorder %s3560_s17, %s3556_s16 }
   0xf   : > { %p3669_p2 = scmp.eq.s32.totalorder %s2411_s23, 3  ;;  %s4569_s25 = smov (%p30_p0, %s29_s25), 0 }
  0x10   : > { %4510 = sst [smem:[#allocation10_spill]] %s4569_s25  ;;  %s4571_s26 = smov (!%p30_p0, %s32_s26), %s3576_s21 }
  0x11   : > { %s84_s29 = ssub.s32 %s3572_s20, %s4569_s25  ;;  %p3680_p3 = por %p3669_p2, %p98_p1 }
  0x12   : > { %p34_p4 = scmp.ge.s32.totalorder %s4571_s26, 2  ;;  %p104_p5 = scmp.ne.s32.totalorder %s3556_s16, %s3552_s15 }
  0x13   : > { %p3686_p6 = scmp.eq.s32.totalorder %s2412_s24, 3  ;;  %s114_s5 = sadd.s32 1, %s3548_s14 }
  0x14   : > { %s4573_s26 = smov (%p34_p4, %s4571_s26), 0  ;;  %p124_p8 = scmp.ne.s32.totalorder %s3548_s14, %s3544_s13 }
  0x15   : > { %4513 = sst [smem:[#allocation11_spill]] %s4573_s26  ;;  %p3695_p7 = por %p3686_p6, %p104_p5 }
  0x16   : > { %s83_s7 = ssub.s32 %s3576_s21, %s4573_s26  ;;  %p130_p9 = scmp.ne.s32.totalorder %s3544_s13, %s3540_s12 }
  0x17   : > { %s85_s8 = sor.u32 %s84_s29, %s83_s7  ;;  %p112_p10 = scmp.eq.s32.totalorder %s83_s7, 0 }
  0x18   : > { %p86_p11 = scmp.eq.s32.totalorder %s85_s8, 0  ;;  %p3707_p12 = por %p124_p8, %p3669_p2 }
  0x19   : > { %s3712_s10 = scalar_select %p112_p10, %s3548_s14, %s114_s5  }
  0x1a   : > { %s3715_s11 = scalar_select %p86_p11, %s3560_s17, %s88_s27  }
  0x1b   : > { %p3719_p13 = por %p130_p9, %p3686_p6  ;;  %p2415_p0 = scmp.ge.s32.totalorder %s3580_s22, 1 }
  0x1c   : > { %p160_p1 = scmp.lt.s32.totalorder %s3580_s22, 5 }
  0x1d   : > { %s4516_s23 = scalar_select %p3719_p13, 1, 0 }
  0x1e   : > { %p161_p4 = pnand %p2415_p0, %p160_p1 }
  0x20   : > { %164 = sbr.rel (%p161_p4) target bundleno = 526 (0x20e), region = 28 }
  0x25   : > { %s4506_s24 = sand.u32 1, %s3556_s16   ;;  %s4505_s28 = sand.u32 1, %s3544_s13  }
  0x26   : > { %s2416_s27 = sshll.u32 %s4506_s24, 6  ;;  %s2417_s29 = sshll.u32 %s4505_s28, 3 }
  0x27   : > { %p189_p2 = scmp.lt.s32.totalorder %s3568_s19, 1  ;;  %s4517_s0 = sld [smem:[#allocation30_spill]] }
  0x28   : > { %s3738_s25 = scalar_lea.vmem [#allocation3], %s2416_s27  ;;  %s3740_s21 = scalar_lea.vmem [#allocation5], %s2417_s29 }
  0x29   : > { %s190_s4 = scalar_select %p189_p2, %s3568_s19, 1 }
  0x2a   : > { %p2420_p5 = scmp.ne.s32.totalorder %s3564_s18, 0 }
  0x2b   : > { %s2747_s5 = sshll.u32 %s190_s4, 8 }
  0x2c   : > { %199 = sbr.rel (%p2420_p5) target bundleno = 94 (0x5e), region = 32 }
  0x2d   : > { %s3736_s26 = scalar_lea.vmem %s4517_s0, %s2747_s5 }
  0x31   : > { %v3744_v0 = vld [vmem:[%s3736_s26] sm:$0xff]  ;;  %vm287_vm0 = vcmask 31744   ;;  %v255_v1 = vld [vmem:[%s3736_s26 + $0x8] sm:$0xff]  ;;  %v256_v2 = vld [vmem:[%s3736_s26 + $0x10] sm:$0xff]  ;;  %v3582_v3 = vmov 0.0  }
  0x32   : > { %203 = vst [vmem:[#allocation2 + $0x18] sm:$0xff] %v3582_v3  ;;  %200 = vst [vmem:[#allocation2] sm:$0xff] %v3582_v3  ;;  %v257_v4 = vld [vmem:[%s3736_s26 + $0x18] sm:$0xff]  ;;  %v258_v5 = vld [vmem:[%s3736_s26 + $0x20] sm:$0xff] }
  0x33   : > { %201 = vst [vmem:[#allocation2 + $0x8] sm:$0xff] %v3582_v3  ;;  %202 = vst [vmem:[#allocation2 + $0x10] sm:$0x3] %v3582_v3  ;;  %v259_v6 = vld [vmem:[%s3736_s26 + $0x28] sm:$0xff]  ;;  %v260_v7 = vld [vmem:[%s3736_s26 + $0x30] sm:$0xff] }
  0x34   : > { %204 = vst [vmem:[#allocation2 + $0x20] sm:$0xff] %v3582_v3  ;;  %205 = vst [vmem:[#allocation2 + $0x28] sm:$0x3] %v3582_v3  ;;  %v261_v8 = vld [vmem:[%s3736_s26 + $0x38] sm:$0xff]  ;;  %v262_v9 = vld [vmem:[%s3736_s26 + $0x40] sm:$0xff] }
  0x35   : > { %206 = vst [vmem:[#allocation2 + $0x30] sm:$0xff] %v3582_v3  ;;  %207 = vst [vmem:[#allocation2 + $0x38] sm:$0xff] %v3582_v3  ;;  %v263_v10 = vld [vmem:[%s3736_s26 + $0x48] sm:$0xff]  ;;  %v264_v11 = vld [vmem:[%s3736_s26 + $0x50] sm:$0xff] }
  0x36   : > { %208 = vst [vmem:[#allocation2 + $0x40] sm:$0x3] %v3582_v3  ;;  %209 = vst [vmem:[#allocation2 + $0x48] sm:$0xff] %v3582_v3  ;;  %v265_v12 = vld [vmem:[%s3736_s26 + $0x58] sm:$0xff]  ;;  %v266_v13 = vld [vmem:[%s3736_s26 + $0x60] sm:$0xff] }
  0x37   : > { %210 = vst [vmem:[#allocation2 + $0x50] sm:$0xff] %v3582_v3  ;;  %211 = vst [vmem:[#allocation2 + $0x58] sm:$0x3] %v3582_v3  ;;  %v267_v14 = vld [vmem:[%s3736_s26 + $0x68] sm:$0xff]  ;;  %v268_v15 = vld [vmem:[%s3736_s26 + $0x70] sm:$0xff] }
  0x38   : > { %212 = vst [vmem:[#allocation2 + $0x60] sm:$0xff] %v3582_v3  ;;  %213 = vst [vmem:[#allocation2 + $0x68] sm:$0xff] %v3582_v3  ;;  %v269_v16 = vld [vmem:[%s3736_s26 + $0x78] sm:$0xff]  ;;  %v270_v17 = vld [vmem:[%s3736_s26 + $0x80] sm:$0xff] }
  0x39   : > { %214 = vst [vmem:[#allocation2 + $0x70] sm:$0x3] %v3582_v3  ;;  %215 = vst [vmem:[#allocation2 + $0x78] sm:$0xff] %v3582_v3  ;;  %v271_v18 = vld [vmem:[%s3736_s26 + $0x88] sm:$0xff]  ;;  %v272_v19 = vld [vmem:[%s3736_s26 + $0x90] sm:$0xff] }
  0x3a   : > { %216 = vst [vmem:[#allocation2 + $0x80] sm:$0xff] %v3582_v3  ;;  %217 = vst [vmem:[#allocation2 + $0x88] sm:$0x3] %v3582_v3  ;;  %v273_v20 = vld [vmem:[%s3736_s26 + $0x98] sm:$0xff]  ;;  %v274_v21 = vld [vmem:[%s3736_s26 + $0xa0] sm:$0xff] }
  0x3b   : > { %218 = vst [vmem:[#allocation2 + $0x90] sm:$0xff] %v3582_v3  ;;  %219 = vst [vmem:[#allocation2 + $0x98] sm:$0xff] %v3582_v3  ;;  %v275_v22 = vld [vmem:[%s3736_s26 + $0xa8] sm:$0xff]  ;;  %v276_v23 = vld [vmem:[%s3736_s26 + $0xb0] sm:$0xff] }
  0x3c   : > { %220 = vst [vmem:[#allocation2 + $0xa0] sm:$0x3] %v3582_v3  ;;  %221 = vst [vmem:[#allocation2 + $0xa8] sm:$0xff] %v3582_v3  ;;  %v277_v24 = vld [vmem:[%s3736_s26 + $0xb8] sm:$0xff]  ;;  %v278_v25 = vld [vmem:[%s3736_s26 + $0xc0] sm:$0xff] }
  0x3d   : > { %222 = vst [vmem:[#allocation2 + $0xb0] sm:$0xff] %v3582_v3  ;;  %223 = vst [vmem:[#allocation2 + $0xb8] sm:$0x3] %v3582_v3  ;;  %v279_v26 = vld [vmem:[%s3736_s26 + $0xc8] sm:$0xff]  ;;  %v280_v27 = vld [vmem:[%s3736_s26 + $0xd0] sm:$0xff] }
  0x3e   : > { %224 = vst [vmem:[#allocation2 + $0xc0] sm:$0xff] %v3582_v3  ;;  %225 = vst [vmem:[#allocation2 + $0xc8] sm:$0xff] %v3582_v3  ;;  %v281_v28 = vld [vmem:[%s3736_s26 + $0xd8] sm:$0xff]  ;;  %v282_v29 = vld [vmem:[%s3736_s26 + $0xe0] sm:$0xff] }
  0x3f   : > { %226 = vst [vmem:[#allocation2 + $0xd0] sm:$0x3] %v3582_v3  ;;  %227 = vst [vmem:[#allocation2 + $0xd8] sm:$0xff] %v3582_v3  ;;  %v283_v30 = vld [vmem:[%s3736_s26 + $0xe8] sm:$0xff]  ;;  %v284_v31 = vld [vmem:[%s3736_s26 + $0xf0] sm:$0xff] }
  0x40   : > { %228 = vst [vmem:[#allocation2 + $0xe0] sm:$0xff] %v3582_v3  ;;  %229 = vst [vmem:[#allocation2 + $0xe8] sm:$0x3] %v3582_v3  ;;  %v285_v32 = vld [vmem:[%s3736_s26 + $0xf8] sm:$0xff] }
  0x41   : > { %230 = vst [vmem:[#allocation2 + $0xf0] sm:$0xff] %v3582_v3  ;;  %231 = vst [vmem:[#allocation2 + $0xf8] sm:$0xff] %v3582_v3 }
  0x42   : > { %232 = vst [vmem:[#allocation2 + $0x100] sm:$0x3] %v3582_v3  ;;  %233 = vst [vmem:[#allocation2 + $0x108] sm:$0xff] %v3582_v3 }
  0x43   : > { %234 = vst [vmem:[#allocation2 + $0x110] sm:$0xff] %v3582_v3  ;;  %235 = vst [vmem:[#allocation2 + $0x118] sm:$0x3] %v3582_v3 }
  0x44   : > { %236 = vst [vmem:[#allocation2 + $0x120] sm:$0xff] %v3582_v3  ;;  %237 = vst [vmem:[#allocation2 + $0x128] sm:$0xff] %v3582_v3 }
  0x45   : > { %238 = vst [vmem:[#allocation2 + $0x130] sm:$0x3] %v3582_v3  ;;  %239 = vst [vmem:[#allocation2 + $0x138] sm:$0xff] %v3582_v3 }
  0x46   : > { %240 = vst [vmem:[#allocation2 + $0x140] sm:$0xff] %v3582_v3  ;;  %241 = vst [vmem:[#allocation2 + $0x148] sm:$0x3] %v3582_v3 }
  0x47   : > { %242 = vst [vmem:[#allocation2 + $0x150] sm:$0xff] %v3582_v3  ;;  %243 = vst [vmem:[#allocation2 + $0x158] sm:$0xff] %v3582_v3 }
  0x48   : > { %244 = vst [vmem:[#allocation2 + $0x160] sm:$0x3] %v3582_v3  ;;  %245 = vst [vmem:[#allocation2 + $0x168] sm:$0xff] %v3582_v3 }
  0x49   : > { %246 = vst [vmem:[#allocation2 + $0x170] sm:$0xff] %v3582_v3  ;;  %247 = vst [vmem:[#allocation2 + $0x178] sm:$0x3] %v3582_v3 }
  0x4a   : > { %248 = vst [vmem:[#allocation2 + $0x180] sm:$0xff] %v3582_v3  ;;  %249 = vst [vmem:[#allocation2 + $0x188] sm:$0xff] %v3582_v3 }
  0x4b   : > { %250 = vst [vmem:[#allocation2 + $0x190] sm:$0x3] %v3582_v3  ;;  %251 = vst [vmem:[#allocation2 + $0x198] sm:$0xff] %v3582_v3 }
  0x4c   : > { %252 = vst [vmem:[#allocation2 + $0x1a0] sm:$0xff] %v3582_v3  ;;  %253 = vst [vmem:[#allocation2 + $0x1a8] sm:$0x3] %v3582_v3 }
  0x4d   : > { %320 = vst [vmem:[%s3740_s21] sm:$0xff] %v3582_v3  ;;  %288 = vst.msk [vmem:[#allocation2 + $0x19] sm:$0xff] %vm287_vm0, %v3744_v0 }
  0x4e   : > { %289 = vst.msk [vmem:[#allocation2 + $0x21] sm:$0xff] %vm287_vm0, %v255_v1  ;;  %290 = vst.msk [vmem:[#allocation2 + $0x31] sm:$0xff] %vm287_vm0, %v256_v2 }
  0x4f   : > { %291 = vst.msk [vmem:[#allocation2 + $0x39] sm:$0xff] %vm287_vm0, %v257_v4  ;;  %292 = vst.msk [vmem:[#allocation2 + $0x49] sm:$0xff] %vm287_vm0, %v258_v5 }
  0x50   : > { %293 = vst.msk [vmem:[#allocation2 + $0x51] sm:$0xff] %vm287_vm0, %v259_v6  ;;  %294 = vst.msk [vmem:[#allocation2 + $0x61] sm:$0xff] %vm287_vm0, %v260_v7 }
  0x51   : > { %295 = vst.msk [vmem:[#allocation2 + $0x69] sm:$0xff] %vm287_vm0, %v261_v8  ;;  %296 = vst.msk [vmem:[#allocation2 + $0x79] sm:$0xff] %vm287_vm0, %v262_v9 }
  0x52   : > { %297 = vst.msk [vmem:[#allocation2 + $0x81] sm:$0xff] %vm287_vm0, %v263_v10  ;;  %298 = vst.msk [vmem:[#allocation2 + $0x91] sm:$0xff] %vm287_vm0, %v264_v11 }
  0x53   : > { %299 = vst.msk [vmem:[#allocation2 + $0x99] sm:$0xff] %vm287_vm0, %v265_v12  ;;  %300 = vst.msk [vmem:[#allocation2 + $0xa9] sm:$0xff] %vm287_vm0, %v266_v13 }
  0x54   : > { %301 = vst.msk [vmem:[#allocation2 + $0xb1] sm:$0xff] %vm287_vm0, %v267_v14  ;;  %302 = vst.msk [vmem:[#allocation2 + $0xc1] sm:$0xff] %vm287_vm0, %v268_v15 }
  0x55   : > { %303 = vst.msk [vmem:[#allocation2 + $0xc9] sm:$0xff] %vm287_vm0, %v269_v16  ;;  %304 = vst.msk [vmem:[#allocation2 + $0xd9] sm:$0xff] %vm287_vm0, %v270_v17 }
  0x56   : > { %305 = vst.msk [vmem:[#allocation2 + $0xe1] sm:$0xff] %vm287_vm0, %v271_v18  ;;  %306 = vst.msk [vmem:[#allocation2 + $0xf1] sm:$0xff] %vm287_vm0, %v272_v19 }
  0x57   : > { %307 = vst.msk [vmem:[#allocation2 + $0xf9] sm:$0xff] %vm287_vm0, %v273_v20  ;;  %308 = vst.msk [vmem:[#allocation2 + $0x109] sm:$0xff] %vm287_vm0, %v274_v21 }
  0x58   : > { %309 = vst.msk [vmem:[#allocation2 + $0x111] sm:$0xff] %vm287_vm0, %v275_v22  ;;  %310 = vst.msk [vmem:[#allocation2 + $0x121] sm:$0xff] %vm287_vm0, %v276_v23 }
  0x59   : > { %311 = vst.msk [vmem:[#allocation2 + $0x129] sm:$0xff] %vm287_vm0, %v277_v24  ;;  %312 = vst.msk [vmem:[#allocation2 + $0x139] sm:$0xff] %vm287_vm0, %v278_v25 }
  0x5a   : > { %313 = vst.msk [vmem:[#allocation2 + $0x141] sm:$0xff] %vm287_vm0, %v279_v26  ;;  %314 = vst.msk [vmem:[#allocation2 + $0x151] sm:$0xff] %vm287_vm0, %v280_v27 }
  0x5b   : > { %315 = vst.msk [vmem:[#allocation2 + $0x159] sm:$0xff] %vm287_vm0, %v281_v28  ;;  %316 = vst.msk [vmem:[#allocation2 + $0x169] sm:$0xff] %vm287_vm0, %v282_v29 }
  0x5c   : > { %317 = vst.msk [vmem:[#allocation2 + $0x171] sm:$0xff] %vm287_vm0, %v283_v30  ;;  %318 = vst.msk [vmem:[#allocation2 + $0x181] sm:$0xff] %vm287_vm0, %v284_v31 }
  0x5d   : > { %319 = vst.msk [vmem:[#allocation2 + $0x189] sm:$0xff] %vm287_vm0, %v285_v32 }
  0x5e PF: > { %v3362_v33 = vld [vmem:[%s4499_s1 + $0x78] sm:$0xff]   ;;  %v3364_v35 = vld [vmem:[%s4499_s1 + $0x70] sm:$0xff]   ;;  %v3366_v37 = vld [vmem:[%s4499_s1 + $0x68] sm:$0xff]   ;;  %s2422_s24 = smul.u32 192, %s3564_s18  ;;  %s2280_s29 = sshll.u32 %s3738_s25, 4  ;;  %s4382_s29 = int_to_ptr.vmem [resolvable:$true] %s2280_s29 }
  0x5f   : > { %v3363_v34 = vld [vmem:[%s4499_s1 + $0x38] sm:$0xff]   ;;  %2955 = vmatprep.subr.bf16.mxu0 %v3362_v33  ;;  %v3365_v36 = vld [vmem:[%s4499_s1 + $0x30] sm:$0xff]   ;;  %v3367_v38 = vld [vmem:[%s4499_s1 + $0x28] sm:$0xff]   ;;  %s4554_s26 = sand.u32 1, %s3556_s16  }
  0x60   : > { %2987 = vmatprep.subr.bf16.mxu1 %v3363_v34  ;;  %2956 = vmatpush3.bf16.msra.mxu0 %v3362_v33  ;;  %v3368_v39 = vld [vmem:[%s4499_s1 + $0x60] sm:$0xff]   ;;  %v3370_v41 = vld [vmem:[%s4499_s1 + $0x58] sm:$0xff]   ;;  %v3372_v43 = vld [vmem:[%s4499_s1 + $0x50] sm:$0xff]   ;;  %s3845_s28 = scalar_lea.vmem [#allocation2], %s2422_s24  ;;  %s2742_s24 = sshll.u32 %s3568_s19, 5 }
  0x61   : > { %2988 = vmatpush3.bf16.msra.mxu1 %v3363_v34  ;;  %2957 = vmatprep.subr.bf16.mxu0 %v3364_v35  ;;  %v3369_v40 = vld [vmem:[%s4499_s1 + $0x20] sm:$0xff]   ;;  %v3371_v42 = vld [vmem:[%s4499_s1 + $0x18] sm:$0xff]   ;;  %v3373_v47 = vld [vmem:[%s4499_s1 + $0x10] sm:$0xff]   ;;  %s4394_s27 = scalar_lea.sflag [#allocation4], %s4554_s26 }
  0x62   : > { %2989 = vmatprep.subr.bf16.mxu1 %v3365_v36  ;;  %v3374_v51 = vld [vmem:[%s4499_s1 + $0x48] sm:$0xff]   ;;  %v3376_v53 = vld [vmem:[%s4499_s1 + $0x40] sm:$0xff]   ;;  %v3378_v59 = vld [vmem:[%s4499_s1 + $0xb8] sm:$0xff]  }
  0x63   : > { %v3375_v52 = vld [vmem:[%s4499_s1 + $0x8] sm:$0xff]   ;;  %v3377_v54 = vld [vmem:[%s4499_s1] sm:$0xff]   ;;  %v3379_v60 = vld [vmem:[%s4499_s1 + $0xf8] sm:$0xff]  }
  0x64   : > { %2958 = vmatpush3.bf16.msra.mxu0 %v3364_v35  ;;  %v364_v44 = vld [vmem:[%s3845_s28 + $0x1] sm:$0xff]  ;;  %v365_v45 = vld [vmem:[%s3845_s28 + $0x9] sm:$0xff]  ;;  %v366_v55 = vld [vmem:[%s3845_s28 + $0x19] sm:$0xff] }
  0x65   : > { %2990 = vmatpush3.bf16.msra.mxu1 %v3365_v36  ;;  %2959 = vmatprep.subr.bf16.mxu0 %v3366_v37  ;;  %v324_v46 = vld [vmem:[%s3845_s28] sm:$0xff]  ;;  %v380_v48 = vpack.c.bf16 %v365_v45, %v364_v44  ;;  %v325_v49 = vld [vmem:[%s3845_s28 + $0x8] sm:$0xff]  ;;  %v326_v57 = vld [vmem:[%s3845_s28 + $0x18] sm:$0xff] }
  0x66   : > { %2991 = vmatprep.subr.bf16.mxu1 %v3367_v38  ;;  %v340_v50 = vpack.c.bf16 %v325_v49, %v324_v46  ;;  %v367_v56 = vld [vmem:[%s3845_s28 + $0x21] sm:$0xff]  ;;  %v368_v62 = vld [vmem:[%s3845_s28 + $0x31] sm:$0xff]  ;;  %v369_v63 = vld [vmem:[%s3845_s28 + $0x39] sm:$0xff] }
  0x67   : > { %2971 = vmatprep.mubr.bf16.mxu0 %v380_v48  ;;  %v327_v58 = vld [vmem:[%s3845_s28 + $0x20] sm:$0xff]  ;;  %v3876_v61 = vpack.c.bf16 %v367_v56, %v366_v55  ;;  %v328_v1 = vld [vmem:[%s3845_s28 + $0x30] sm:$0xff]  ;;  %v329_v2 = vld [vmem:[%s3845_s28 + $0x38] sm:$0xff]  ;;  %v3890_v5 = vpack.c.bf16 %v369_v63, %v368_v62 }
  0x68   : > { %2960 = vmatpush3.bf16.msra.mxu0 %v3366_v37  ;;  %3003 = vmatprep.mubr.bf16.mxu1 %v340_v50  ;;  %v3880_v0 = vpack.c.bf16 %v327_v58, %v326_v57  ;;  %v3380_v3 = vld [vmem:[%s4499_s1 + $0xb0] sm:$0xff]   ;;  %v3893_v6 = vpack.c.bf16 %v329_v2, %v328_v1  ;;  %v330_v9 = vld [vmem:[%s3845_s28 + $0x48] sm:$0xff]  ;;  %v3384_v15 = vld [vmem:[%s4499_s1 + $0xa0] sm:$0xff]  }
  0x69   : > { %2992 = vmatpush3.bf16.msra.mxu1 %v3367_v38  ;;  %2961 = vmatprep.subr.bf16.mxu0 %v3368_v39  ;;  %v3381_v4 = vld [vmem:[%s4499_s1 + $0xf0] sm:$0xff]   ;;  %v3382_v11 = vld [vmem:[%s4499_s1 + $0xa8] sm:$0xff]   ;;  %v332_v17 = vld [vmem:[%s3845_s28 + $0x60] sm:$0xff] }
  0x6a   : > { %2993 = vmatprep.subr.bf16.mxu1 %v3369_v40  ;;  %v370_v7 = vld [vmem:[%s3845_s28 + $0x49] sm:$0xff]  ;;  %v371_v8 = vld [vmem:[%s3845_s28 + $0x51] sm:$0xff]  ;;  %v372_v13 = vld [vmem:[%s3845_s28 + $0x61] sm:$0xff] }
  0x6b   : > { %v331_v10 = vld [vmem:[%s3845_s28 + $0x50] sm:$0xff]  ;;  %v3383_v12 = vld [vmem:[%s4499_s1 + $0xe8] sm:$0xff]   ;;  %v3909_v14 = vpack.c.bf16 %v371_v8, %v370_v7  ;;  %v3385_v20 = vld [vmem:[%s4499_s1 + $0xe0] sm:$0xff]  }
  0x6c   : > { %2962 = vmatpush3.bf16.msra.mxu0 %v3368_v39  ;;  %v373_v16 = vld [vmem:[%s3845_s28 + $0x69] sm:$0xff]  ;;  %v3916_v18 = vpack.c.bf16 %v331_v10, %v330_v9  ;;  %v374_v22 = vld [vmem:[%s3845_s28 + $0x79] sm:$0xff]  ;;  %v375_v24 = vld [vmem:[%s3845_s28 + $0x81] sm:$0xff] }
  0x6d   : > { %2994 = vmatpush3.bf16.msra.mxu1 %v3369_v40  ;;  %2963 = vmatprep.subr.bf16.mxu0 %v3370_v41  ;;  %v333_v19 = vld [vmem:[%s3845_s28 + $0x68] sm:$0xff]  ;;  %v3922_v21 = vpack.c.bf16 %v373_v16, %v372_v13  ;;  %v334_v25 = vld [vmem:[%s3845_s28 + $0x78] sm:$0xff]  ;;  %v335_v26 = vld [vmem:[%s3845_s28 + $0x80] sm:$0xff]  ;;  %v3942_v31 = vpack.c.bf16 %v375_v24, %v374_v22 }
  0x6e   : > { %2995 = vmatprep.subr.bf16.mxu1 %v3371_v42  ;;  %v3926_v23 = vpack.c.bf16 %v333_v19, %v332_v17  ;;  %v3386_v27 = vld [vmem:[%s4499_s1 + $0x98] sm:$0xff]   ;;  %v336_v32 = vld [vmem:[%s3845_s28 + $0x90] sm:$0xff]  ;;  %v3945_v33 = vpack.c.bf16 %v335_v26, %v334_v25  ;;  %v3391_v44 = vld [vmem:[%s4499_s1 + $0xc8] sm:$0xff]  }
  0x6f   : > { %v3387_v28 = vld [vmem:[%s4499_s1 + $0xd8] sm:$0xff]   ;;  %v3388_v35 = vld [vmem:[%s4499_s1 + $0x90] sm:$0xff]   ;;  %v695_v46 = vld [vmem:[%s3845_s28 + $0x2] sm:$0xff] }
  0x70   : > { %2964 = vmatpush3.bf16.msra.mxu0 %v3370_v41  ;;  %v376_v29 = vld [vmem:[%s3845_s28 + $0x91] sm:$0xff]  ;;  %v377_v30 = vld [vmem:[%s3845_s28 + $0x99] sm:$0xff]  ;;  %v378_v38 = vld [vmem:[%s3845_s28 + $0xa9] sm:$0xff] }
  0x71   : > { %2996 = vmatpush3.bf16.msra.mxu1 %v3371_v42  ;;  %2965 = vmatprep.subr.bf16.mxu0 %v3372_v43  ;;  %v337_v34 = vld [vmem:[%s3845_s28 + $0x98] sm:$0xff]  ;;  %v3389_v36 = vld [vmem:[%s4499_s1 + $0xd0] sm:$0xff]   ;;  %v3954_v37 = vpack.c.bf16 %v377_v30, %v376_v29  ;;  %v338_v41 = vld [vmem:[%s3845_s28 + $0xa8] sm:$0xff] }
  0x72   : > { %2997 = vmatprep.subr.bf16.mxu1 %v3373_v47  ;;  %v379_v39 = vld [vmem:[%s3845_s28 + $0xb1] sm:$0xff]  ;;  %v3959_v40 = vpack.c.bf16 %v337_v34, %v336_v32  ;;  %v3392_v49 = vld [vmem:[%s4499_s1 + $0x80] sm:$0xff]   ;;  %v3398_v1 = vld [vmem:[%s4499_s1 + $0x128] sm:$0xff]  }
  0x73   : > { %v339_v42 = vld [vmem:[%s3845_s28 + $0xb0] sm:$0xff]  ;;  %v3972_v45 = vpack.c.bf16 %v379_v39, %v378_v38  ;;  %v3393_v50 = vld [vmem:[%s4499_s1 + $0xc0] sm:$0xff]   ;;  %v3395_v55 = vld [vmem:[%s4499_s1 + $0x178] sm:$0xff]  }
  0x74   : > { %2966 = vmatpush3.bf16.msra.mxu0 %v3372_v43  ;;  %v3390_v43 = vld [vmem:[%s4499_s1 + $0x88] sm:$0xff]   ;;  %v3976_v48 = vpack.c.bf16 %v339_v42, %v338_v41  ;;  %v699_v56 = vld [vmem:[%s3845_s28 + $0x32] sm:$0xff]  ;;  %v700_v58 = vld [vmem:[%s3845_s28 + $0x3a] sm:$0xff] }
  0x75   : > { %2998 = vmatpush3.bf16.msra.mxu1 %v3373_v47  ;;  %2967 = vmatprep.subr.bf16.mxu0 %v3374_v51  ;;  %v696_v47 = vld [vmem:[%s3845_s28 + $0xa] sm:$0xff]  ;;  %v4005_v62 = vpack.c.bf16 %v700_v58, %v699_v56  ;;  %v3400_v8 = vld [vmem:[%s4499_s1 + $0x120] sm:$0xff]   ;;  %v3402_v13 = vld [vmem:[%s4499_s1 + $0x118] sm:$0xff]  }
  0x76   : > { %2999 = vmatprep.subr.bf16.mxu1 %v3375_v52  ;;  %v701_v63 = vld [vmem:[%s3845_s28 + $0x4a] sm:$0xff]  ;;  %v3401_v9 = vld [vmem:[%s4499_s1 + $0x160] sm:$0xff]   ;;  %v707_v16 = vld [vmem:[%s3845_s28 + $0x92] sm:$0xff] }
  0x77   : > { %v3399_v2 = vld [vmem:[%s4499_s1 + $0x168] sm:$0xff]   ;;  %v708_v19 = vld [vmem:[%s3845_s28 + $0x9a] sm:$0xff]  ;;  %v3405_v22 = vld [vmem:[%s4499_s1 + $0x150] sm:$0xff]  }
  0x78   : > { %2968 = vmatpush3.bf16.msra.mxu0 %v3374_v51  ;;  %v711_v51 = vpack.c.bf16 %v696_v47, %v695_v46  ;;  %v704_v7 = vld [vmem:[%s3845_s28 + $0x6a] sm:$0xff]  ;;  %v4053_v24 = vpack.c.bf16 %v708_v19, %v707_v16  ;;  %v710_v26 = vld [vmem:[%s3845_s28 + $0xb2] sm:$0xff]  ;;  %v3417_v46 = vld [vmem:[%s4499_s1 + $0x1e0] sm:$0xff]  }
  0x79   : > { %3000 = vmatpush3.bf16.msra.mxu1 %v3375_v52  ;;  %2969 = vmatprep.subr.bf16.mxu0 %v3376_v53  ;;  %v697_v52 = vld [vmem:[%s3845_s28 + $0x1a] sm:$0xff]  ;;  %v709_v25 = vld [vmem:[%s3845_s28 + $0xaa] sm:$0xff] }
  0x7a   : > { %3001 = vmatprep.subr.bf16.mxu1 %v3377_v54  ;;  %v3406_v29 = vld [vmem:[%s4499_s1 + $0x108] sm:$0xff]   ;;  %v4069_v32 = vpack.c.bf16 %v710_v26, %v709_v25  ;;  %v3410_v38 = vld [vmem:[%s4499_s1 + $0x1b8] sm:$0xff]   ;;  %v3412_v41 = vld [vmem:[%s4499_s1 + $0x1b0] sm:$0xff]  }
  0x7b   : > { %v3407_v30 = vld [vmem:[%s4499_s1 + $0x148] sm:$0xff]   ;;  %v3411_v39 = vld [vmem:[%s4499_s1 + $0x1f8] sm:$0xff]   ;;  %v3413_v42 = vld [vmem:[%s4499_s1 + $0x1f0] sm:$0xff]  }
  0x7c   : > { %2970 = vmatpush3.bf16.msra.mxu0 %v3376_v53  ;;  %v698_v53 = vld [vmem:[%s3845_s28 + $0x22] sm:$0xff]  ;;  %v3418_v47 = vld [vmem:[%s4499_s1 + $0x198] sm:$0xff]  }
  0x7d   : > { %3002 = vmatpush3.bf16.msra.mxu1 %v3377_v54  ;;  %3019 = vmatprep.subr.bf16.mxu0 %v3378_v59  ;;  %v3394_v54 = vld [vmem:[%s4499_s1 + $0x138] sm:$0xff]   ;;  %v3996_v57 = vpack.c.bf16 %v698_v53, %v697_v52  ;;  %v2535_v52 = vld [vmem:[%s3845_s28 + $0xc1] sm:$0xff]  ;;  %v2536_v53 = vld [vmem:[%s3845_s28 + $0xc9] sm:$0xff] }
  0x7e   : > { %3051 = vmatprep.subr.bf16.mxu1 %v3379_v60  ;;  %v3422_v56 = vld [vmem:[%s4499_s1 + $0x188] sm:$0xff]   ;;  %v1125_v58 = vpack.c.bf16 %v2536_v53, %v2535_v52 }
  0x7f   : > { %2972 = vmatmul.mubr.bf16.vlgmr.msra.gmra.mxu0 %v3876_v61 }
  0x80   : > { %3004 = vmatmul.mubr.bf16.vlgmr.msra.gmra.mxu1 %v3880_v0  ;;  %3020 = vmatpush3.bf16.msra.mxu0 %v3378_v59  ;;  %v3396_v59 = vld [vmem:[%s4499_s1 + $0x130] sm:$0xff]  }
  0x81   : > { %3052 = vmatpush3.bf16.msra.mxu1 %v3379_v60  ;;  %3021 = vmatprep.subr.bf16.mxu0 %v3380_v3  ;;  %v3397_v60 = vld [vmem:[%s4499_s1 + $0x170] sm:$0xff]  }
  0x82   : > { %3053 = vmatprep.subr.bf16.mxu1 %v3381_v4  ;;  %2975 = vmatprep.mubr.bf16.mxu0 %v3890_v5 }
  0x83   : > { %3007 = vmatprep.mubr.bf16.mxu1 %v3893_v6 }
  0x84   : > { %3022 = vmatpush3.bf16.msra.mxu0 %v3380_v3  ;;  %v703_v3 = vld [vmem:[%s3845_s28 + $0x62] sm:$0xff] }
  0x85   : > { %3054 = vmatpush3.bf16.msra.mxu1 %v3381_v4  ;;  %3023 = vmatprep.subr.bf16.mxu0 %v3382_v11  ;;  %v4029_v10 = vpack.c.bf16 %v704_v7, %v703_v3  ;;  %v2698_v3 = vld [vmem:[%s3845_s28 + $0xe2] sm:$0xff] }
  0x86   : > { %3055 = vmatprep.subr.bf16.mxu1 %v3383_v12 }
  0x87   : > { %2976 = vmatmul.mubr.bf16.gmra.mxu0 %v3909_v14 }
  0x88   : > { %3008 = vmatmul.mubr.bf16.gmra.mxu1 %v3916_v18  ;;  %3024 = vmatpush3.bf16.msra.mxu0 %v3382_v11  ;;  %v705_v11 = vld [vmem:[%s3845_s28 + $0x7a] sm:$0xff] }
  0x89   : > { %3056 = vmatpush3.bf16.msra.mxu1 %v3383_v12  ;;  %3025 = vmatprep.subr.bf16.mxu0 %v3384_v15  ;;  %v706_v12 = vld [vmem:[%s3845_s28 + $0x82] sm:$0xff] }
  0x8a   : > { %3057 = vmatprep.subr.bf16.mxu1 %v3385_v20  ;;  %2979 = vmatprep.mubr.bf16.mxu0 %v3922_v21  ;;  %v4044_v17 = vpack.c.bf16 %v706_v12, %v705_v11 }
  0x8b   : > { %3011 = vmatprep.mubr.bf16.mxu1 %v3926_v23 }
  0x8c   : > { %3026 = vmatpush3.bf16.msra.mxu0 %v3384_v15  ;;  %v3403_v15 = vld [vmem:[%s4499_s1 + $0x158] sm:$0xff]  }
  0x8d   : > { %3058 = vmatpush3.bf16.msra.mxu1 %v3385_v20  ;;  %3027 = vmatprep.subr.bf16.mxu0 %v3386_v27  ;;  %v3404_v20 = vld [vmem:[%s4499_s1 + $0x110] sm:$0xff]  }
  0x8e   : > { %3059 = vmatprep.subr.bf16.mxu1 %v3387_v28 }
  0x8f   : > { %2980 = vmatmul.mubr.bf16.gmra.mxu0 %v3942_v31 }
  0x90   : > { %3012 = vmatmul.mubr.bf16.gmra.mxu1 %v3945_v33  ;;  %3028 = vmatpush3.bf16.msra.mxu0 %v3386_v27  ;;  %v2495_v27 = vld [vmem:[%s3845_s28 + $0xc0] sm:$0xff] }
  0x91   : > { %3060 = vmatpush3.bf16.msra.mxu1 %v3387_v28  ;;  %3029 = vmatprep.subr.bf16.mxu0 %v3388_v35  ;;  %v2496_v28 = vld [vmem:[%s3845_s28 + $0xc8] sm:$0xff] }
  0x92   : > { %3061 = vmatprep.subr.bf16.mxu1 %v3389_v36  ;;  %2983 = vmatprep.mubr.bf16.mxu0 %v3954_v37  ;;  %v4071_v34 = vpack.c.bf16 %v2496_v28, %v2495_v27 }
  0x93   : > { %3015 = vmatprep.mubr.bf16.mxu1 %v3959_v40 }
  0x94   : > { %3030 = vmatpush3.bf16.msra.mxu0 %v3388_v35  ;;  %v3408_v35 = vld [vmem:[%s4499_s1 + $0x100] sm:$0xff]  }
  0x95   : > { %3062 = vmatpush3.bf16.msra.mxu1 %v3389_v36  ;;  %3031 = vmatprep.subr.bf16.mxu0 %v3390_v43  ;;  %v3409_v36 = vld [vmem:[%s4499_s1 + $0x140] sm:$0xff]  }
  0x96   : > { %3063 = vmatprep.subr.bf16.mxu1 %v3391_v44 }
  0x97   : > { %2984 = vmatmul.mubr.bf16.gmra.mxu0 %v3972_v45 }
  0x98   : > { %3016 = vmatmul.mubr.bf16.gmra.mxu1 %v3976_v48  ;;  %3032 = vmatpush3.bf16.msra.mxu0 %v3390_v43  ;;  %v3415_v43 = vld [vmem:[%s4499_s1 + $0x1e8] sm:$0xff]  }
  0x99   : > { %3064 = vmatpush3.bf16.msra.mxu1 %v3391_v44  ;;  %3033 = vmatprep.subr.bf16.mxu0 %v3392_v49  ;;  %v3416_v44 = vld [vmem:[%s4499_s1 + $0x1a0] sm:$0xff]  }
  0x9a   : > { %3065 = vmatprep.subr.bf16.mxu1 %v3393_v50  ;;  %3035 = vmatprep.mubr.bf16.mxu0 %v711_v51  ;;  %v3421_v51 = vld [vmem:[%s4499_s1 + $0x1d0] sm:$0xff]  }
  0x9b   : > { %3067 = vmatprep.mubr.bf16.mxu1 %v3880_v0  ;;  %v702_v0 = vld [vmem:[%s3845_s28 + $0x52] sm:$0xff] }
  0x9c   : > { %3034 = vmatpush3.bf16.msra.mxu0 %v3392_v49  ;;  %v4020_v4 = vpack.c.bf16 %v702_v0, %v701_v63  ;;  %v3419_v49 = vld [vmem:[%s4499_s1 + $0x1d8] sm:$0xff]   ;;  %v3425_v63 = vld [vmem:[%s4499_s1 + $0x1c0] sm:$0xff]  }
  0x9d   : > { %3066 = vmatpush3.bf16.msra.mxu1 %v3393_v50  ;;  %3083 = vmatprep.subr.bf16.mxu0 %v3394_v54  ;;  %v3420_v50 = vld [vmem:[%s4499_s1 + $0x190] sm:$0xff]   ;;  %v3426_v0 = vld [vmem:[%s4499_s1 + $0x238] sm:$0xff]  }
  0x9e   : > { %3115 = vmatprep.subr.bf16.mxu1 %v3395_v55 }
  0x9f   : > { %3036 = vmatmul.mubr.bf16.vlgmr.msra.gmra.mxu0 %v3996_v57 }
  0xa0   : > { %3068 = vmatmul.mubr.bf16.vlgmr.msra.gmra.mxu1 %v3893_v6  ;;  %3084 = vmatpush3.bf16.msra.mxu0 %v3394_v54  ;;  %v2575_v54 = vld [vmem:[%s3845_s28 + $0xc2] sm:$0xff] }
  0xa1   : > { %3116 = vmatpush3.bf16.msra.mxu1 %v3395_v55  ;;  %3085 = vmatprep.subr.bf16.mxu0 %v3396_v59  ;;  %v2576_v55 = vld [vmem:[%s3845_s28 + $0xca] sm:$0xff] }
  0xa2   : > { %3117 = vmatprep.subr.bf16.mxu1 %v3397_v60  ;;  %3039 = vmatprep.mubr.bf16.mxu0 %v4005_v62 }
  0xa3   : > { %3071 = vmatprep.mubr.bf16.mxu1 %v3916_v18 }
  0xa4   : > { %3086 = vmatpush3.bf16.msra.mxu0 %v3396_v59  ;;  %v4141_v59 = vpack.c.bf16 %v2576_v55, %v2575_v54 }
  0xa5   : > { %3118 = vmatpush3.bf16.msra.mxu1 %v3397_v60  ;;  %3087 = vmatprep.subr.bf16.mxu0 %v3398_v1  ;;  %v3424_v60 = vld [vmem:[%s4499_s1 + $0x180] sm:$0xff]  }
  0xa6   : > { %3119 = vmatprep.subr.bf16.mxu1 %v3399_v2 }
  0xa7   : > { %3040 = vmatmul.mubr.bf16.gmra.mxu0 %v4020_v4 }
  0xa8   : > { %3072 = vmatmul.mubr.bf16.gmra.mxu1 %v3926_v23  ;;  %3088 = vmatpush3.bf16.msra.mxu0 %v3398_v1  ;;  %v3427_v1 = vld [vmem:[%s4499_s1 + $0x230] sm:$0xff]  }
  0xa9   : > { %3120 = vmatpush3.bf16.msra.mxu1 %v3399_v2  ;;  %3089 = vmatprep.subr.bf16.mxu0 %v3400_v8  ;;  %v2697_v2 = vld [vmem:[%s3845_s28 + $0xda] sm:$0xff] }
  0xaa   : > { %3121 = vmatprep.subr.bf16.mxu1 %v3401_v9  ;;  %3043 = vmatprep.mubr.bf16.mxu0 %v4029_v10  ;;  %v1936_v7 = vpack.c.bf16 %v2698_v3, %v2697_v2 }
  0xab   : > { %3075 = vmatprep.mubr.bf16.mxu1 %v3945_v33 }
  0xac   : > { %3090 = vmatpush3.bf16.msra.mxu0 %v3400_v8 }
  0xad   : > { %3122 = vmatpush3.bf16.msra.mxu1 %v3401_v9  ;;  %3091 = vmatprep.subr.bf16.mxu0 %v3402_v13 }
  0xae   : > { %3123 = vmatprep.subr.bf16.mxu1 %v3403_v15 }
  0xaf   : > { %3044 = vmatmul.mubr.bf16.gmra.mxu0 %v4044_v17 }
  0xb0   : > { %3076 = vmatmul.mubr.bf16.gmra.mxu1 %v3959_v40  ;;  %3092 = vmatpush3.bf16.msra.mxu0 %v3402_v13 }
  0xb1   : > { %3124 = vmatpush3.bf16.msra.mxu1 %v3403_v15  ;;  %3093 = vmatprep.subr.bf16.mxu0 %v3404_v20 }
  0xb2   : > { %3125 = vmatprep.subr.bf16.mxu1 %v3405_v22  ;;  %3047 = vmatprep.mubr.bf16.mxu0 %v4053_v24 }
  0xb3   : > { %3079 = vmatprep.mubr.bf16.mxu1 %v3976_v48 }
  0xb4   : > { %3094 = vmatpush3.bf16.msra.mxu0 %v3404_v20 }
  0xb5   : > { %3126 = vmatpush3.bf16.msra.mxu1 %v3405_v22  ;;  %3095 = vmatprep.subr.bf16.mxu0 %v3406_v29 }
  0xb6   : > { %3127 = vmatprep.subr.bf16.mxu1 %v3407_v30 }
  0xb7   : > { %3048 = vmatmul.mubr.bf16.gmra.mxu0 %v4069_v32 }
  0xb8   : > { %3080 = vmatmul.mubr.bf16.gmra.mxu1 %v4071_v34  ;;  %3096 = vmatpush3.bf16.msra.mxu0 %v3406_v29 }
  0xb9   : > { %3128 = vmatpush3.bf16.msra.mxu1 %v3407_v30  ;;  %3097 = vmatprep.subr.bf16.mxu0 %v3408_v35 }
  0xba   : > { %3129 = vmatprep.subr.bf16.mxu1 %v3409_v36  ;;  %3099 = vmatprep.mubr.bf16.mxu0 %v3876_v61  ;;  %v3414_v61 = vld [vmem:[%s4499_s1 + $0x1a8] sm:$0xff]  }
  0xbb   : > { %3131 = vmatprep.mubr.bf16.mxu1 %v3996_v57  ;;  %v3423_v57 = vld [vmem:[%s4499_s1 + $0x1c8] sm:$0xff]  }
  0xbc   : > { %3098 = vmatpush3.bf16.msra.mxu0 %v3408_v35 }
  0xbd   : > { %3130 = vmatpush3.bf16.msra.mxu1 %v3409_v36  ;;  %3147 = vmatprep.subr.bf16.mxu0 %v3410_v38 }
  0xbe   : > { %3179 = vmatprep.subr.bf16.mxu1 %v3411_v39 }
  0xbf   : > { %3100 = vmatmul.mubr.bf16.vlgmr.msra.gmra.mxu0 %v3890_v5 }
  0xc0   : > { %3132 = vmatmul.mubr.bf16.vlgmr.msra.gmra.mxu1 %v4005_v62  ;;  %3148 = vmatpush3.bf16.msra.mxu0 %v3410_v38 }
  0xc1   : > { %3180 = vmatpush3.bf16.msra.mxu1 %v3411_v39  ;;  %3149 = vmatprep.subr.bf16.mxu0 %v3412_v41 }
  0xc2   : > { %3181 = vmatprep.subr.bf16.mxu1 %v3413_v42  ;;  %3103 = vmatprep.mubr.bf16.mxu0 %v3909_v14 }
  0xc3   : > { %3135 = vmatprep.mubr.bf16.mxu1 %v4020_v4 }
  0xc4   : > { %3150 = vmatpush3.bf16.msra.mxu0 %v3412_v41 }
  0xc5   : > { %3182 = vmatpush3.bf16.msra.mxu1 %v3413_v42  ;;  %3151 = vmatprep.subr.bf16.mxu0 %v3414_v61 }
  0xc6   : > { %3183 = vmatprep.subr.bf16.mxu1 %v3415_v43 }
  0xc7   : > { %3104 = vmatmul.mubr.bf16.gmra.mxu0 %v3922_v21 }
  0xc8   : > { %3136 = vmatmul.mubr.bf16.gmra.mxu1 %v4029_v10  ;;  %3152 = vmatpush3.bf16.msra.mxu0 %v3414_v61 }
  0xc9   : > { %3184 = vmatpush3.bf16.msra.mxu1 %v3415_v43  ;;  %3153 = vmatprep.subr.bf16.mxu0 %v3416_v44 }
  0xca   : > { %3185 = vmatprep.subr.bf16.mxu1 %v3417_v46  ;;  %3107 = vmatprep.mubr.bf16.mxu0 %v3942_v31 }
  0xcb   : > { %3139 = vmatprep.mubr.bf16.mxu1 %v4044_v17 }
  0xcc   : > { %3154 = vmatpush3.bf16.msra.mxu0 %v3416_v44 }
  0xcd   : > { %3186 = vmatpush3.bf16.msra.mxu1 %v3417_v46  ;;  %3155 = vmatprep.subr.bf16.mxu0 %v3418_v47 }
  0xce   : > { %3187 = vmatprep.subr.bf16.mxu1 %v3419_v49 }
  0xcf   : > { %3108 = vmatmul.mubr.bf16.gmra.mxu0 %v3954_v37 }
  0xd0   : > { %3140 = vmatmul.mubr.bf16.gmra.mxu1 %v4053_v24  ;;  %3156 = vmatpush3.bf16.msra.mxu0 %v3418_v47 }
  0xd1   : > { %3188 = vmatpush3.bf16.msra.mxu1 %v3419_v49  ;;  %3157 = vmatprep.subr.bf16.mxu0 %v3420_v50 }
  0xd2   : > { %3189 = vmatprep.subr.bf16.mxu1 %v3421_v51  ;;  %3111 = vmatprep.mubr.bf16.mxu0 %v3972_v45 }
  0xd3   : > { %3143 = vmatprep.mubr.bf16.mxu1 %v4069_v32 }
  0xd4   : > { %3158 = vmatpush3.bf16.msra.mxu0 %v3420_v50 }
  0xd5   : > { %3190 = vmatpush3.bf16.msra.mxu1 %v3421_v51  ;;  %3159 = vmatprep.subr.bf16.mxu0 %v3422_v56 }
  0xd6   : > { %3191 = vmatprep.subr.bf16.mxu1 %v3423_v57 }
  0xd7   : > { %3112 = vmatmul.mubr.bf16.gmra.mxu0 %v1125_v58 }
  0xd8   : > { %3144 = vmatmul.mubr.bf16.gmra.mxu1 %v4141_v59  ;;  %3160 = vmatpush3.bf16.msra.mxu0 %v3422_v56 }
  0xd9   : > { %3192 = vmatpush3.bf16.msra.mxu1 %v3423_v57  ;;  %3161 = vmatprep.subr.bf16.mxu0 %v3424_v60 }
  0xda   : > { %3193 = vmatprep.subr.bf16.mxu1 %v3425_v63  ;;  %3163 = vmatprep.mubr.bf16.mxu0 %v3893_v6  ;;  %v3428_v6 = vld [vmem:[%s4499_s1 + $0x228] sm:$0xff]  }
  0xdb   : > { %3195 = vmatprep.mubr.bf16.mxu1 %v3890_v5  ;;  %v3429_v5 = vld [vmem:[%s4499_s1 + $0x220] sm:$0xff]  }
  0xdc   : > { %3162 = vmatpush3.bf16.msra.mxu0 %v3424_v60 }
  0xdd   : > { %3194 = vmatpush3.bf16.msra.mxu1 %v3425_v63  ;;  %3211 = vmatprep.subr.bf16.mxu0 %v3426_v0 }
  0xde   : > { %3243 = vmatprep.subr.bf16.mxu1 %v3426_v0 }
  0xdf   : > { %3164 = vmatmul.mubr.bf16.vlgmr.msra.gmra.mxu0 %v3916_v18  ;;  %v3431_v18 = vld [vmem:[%s4499_s1 + $0x210] sm:$0xff]  }
  0xe0   : > { %3196 = vmatmul.mubr.bf16.vlgmr.msra.gmra.mxu1 %v3909_v14  ;;  %3212 = vmatpush3.bf16.msra.mxu0 %v3426_v0  ;;  %v3430_v14 = vld [vmem:[%s4499_s1 + $0x218] sm:$0xff]  }
  0xe1   : > { %3251 = vmatpush3.bf16.msra.mxu1 %v3426_v0  ;;  %3213 = vmatprep.subr.bf16.mxu0 %v3427_v1 }
  0xe2   : > { %3244 = vmatprep.subr.bf16.mxu1 %v3427_v1  ;;  %3167 = vmatprep.mubr.bf16.mxu0 %v3926_v23  ;;  %v2618_v23 = vld [vmem:[%s3845_s28 + $0xe0] sm:$0xff] }
  0xe3   : > { %3199 = vmatprep.mubr.bf16.mxu1 %v3922_v21  ;;  %v2617_v21 = vld [vmem:[%s3845_s28 + $0xd8] sm:$0xff] }
  0xe4   : > { %3214 = vmatpush3.bf16.msra.mxu0 %v3427_v1 }
  0xe5   : > { %3252 = vmatpush3.bf16.msra.mxu1 %v3427_v1  ;;  %3215 = vmatprep.subr.bf16.mxu0 %v3428_v6 }
  0xe6   : > { %3245 = vmatprep.subr.bf16.mxu1 %v3428_v6 }
  0xe7   : > { %3168 = vmatmul.mubr.bf16.gmra.mxu0 %v3945_v33  ;;  %v2658_v33 = vld [vmem:[%s3845_s28 + $0xe1] sm:$0xff] }
  0xe8   : > { %3200 = vmatmul.mubr.bf16.gmra.mxu1 %v3942_v31  ;;  %3216 = vmatpush3.bf16.msra.mxu0 %v3428_v6  ;;  %v2657_v31 = vld [vmem:[%s3845_s28 + $0xd9] sm:$0xff]  ;;  %s2741_s28 = sshll.u32 %s3564_s18, 4 }
  0xe9   : > { %3253 = vmatpush3.bf16.msra.mxu1 %v3428_v6  ;;  %3217 = vmatprep.subr.bf16.mxu0 %v3429_v5  ;;  %s4369_s18 = sadd.s32 %s2742_s24, %s2741_s28  ;;  %s3434_s28 = scalar_lea.vmem %s4382_s29, 1024 }
  0xea   : > { %3246 = vmatprep.subr.bf16.mxu1 %v3429_v5  ;;  %3171 = vmatprep.mubr.bf16.mxu0 %v3959_v40  ;;  %v1532_v40 = vpack.c.bf16 %v2618_v23, %v2617_v21  ;;  %s2743_s4 = sshll.u32 %s4369_s18, 6  ;;  %p3435_p6 = scmp.ne.s32.totalorder %s4382_s29, %s3434_s28 }
  0xeb   : > { %3203 = vmatprep.mubr.bf16.mxu1 %v3954_v37  ;;  %v3432_v37 = vld [vmem:[%s4499_s1 + $0x208] sm:$0xff]   ;;  %s4388_s8 = scalar_lea.hbm %s4500_s2, %s2743_s4  ;;  %s3583_s24 = smov [#allocation3]  }
  0xec   : > { %3218 = vmatpush3.bf16.msra.mxu0 %v3429_v5  ;;  %p3436_p8 = pnand %p3435_p6, %p3680_p3  ;;  %s3438_s18 = sshll.u32 %s3583_s24, 4  ;;  %s3439_s18 = int_to_ptr.vmem [resolvable:$false] %s3438_s18 }
  0xed   : > { %3254 = vmatpush3.bf16.msra.mxu1 %v3429_v5  ;;  %3219 = vmatprep.subr.bf16.mxu0 %v3430_v14  ;;  %s3440_s5 = scalar_lea.vmem %s3439_s18, 2048  ;;  %p3441_p10 = scmp.lt.s32.totalorder %s4382_s29, %s3439_s18 }
  0xee   : > { %3247 = vmatprep.subr.bf16.mxu1 %v3430_v14  ;;  %p3437_p9 = pneg %p3436_p8  ;;  %p3442_p11 = scmp.lt.s32.totalorder %s3440_s5, %s3434_s28 }
  0xef   : > { %3172 = vmatmul.mubr.bf16.gmra.mxu0 %v3976_v48  ;;  %v1734_v48 = vpack.c.bf16 %v2658_v33, %v2657_v31 }
  0xf0   : > { %3204 = vmatmul.mubr.bf16.gmra.mxu1 %v3972_v45  ;;  %3220 = vmatpush3.bf16.msra.mxu0 %v3430_v14  ;;  %v3433_v45 = vld [vmem:[%s4499_s1 + $0x200] sm:$0xff]   ;;  %p3443_p0 = por %p3442_p11, %p3441_p10 }
  0xf1   : > { %3255 = vmatpush3.bf16.msra.mxu1 %v3430_v14  ;;  %3221 = vmatprep.subr.bf16.mxu0 %v3431_v18 }
  0xf2   : > { %3248 = vmatprep.subr.bf16.mxu1 %v3431_v18  ;;  %3175 = vmatprep.mubr.bf16.mxu0 %v4071_v34  ;;  %p3444_p1 = pnand %p3443_p0, %p3437_p9 }
  0xf3   : > { %3207 = vmatprep.mubr.bf16.mxu1 %v1125_v58 }
  0xf4   : > { %3222 = vmatpush3.bf16.msra.mxu0 %v3431_v18 }
  0xf5   : > { %3256 = vmatpush3.bf16.msra.mxu1 %v3431_v18  ;;  %3223 = vmatprep.subr.bf16.mxu0 %v3432_v37 }
  0xf6   : > { %3249 = vmatprep.subr.bf16.mxu1 %v3432_v37 }
  0xf7   : > { %3176 = vmatmul.mubr.bf16.gmra.mxu0 %v1532_v40 }
  0xf8   : > { %3208 = vmatmul.mubr.bf16.gmra.mxu1 %v1734_v48  ;;  %3224 = vmatpush3.bf16.msra.mxu0 %v3432_v37 }
  0xf9   : > { %3257 = vmatpush3.bf16.msra.mxu1 %v3432_v37  ;;  %3225 = vmatprep.subr.bf16.mxu0 %v3433_v45 }
  0xfa   : > { %3250 = vmatprep.subr.bf16.mxu1 %v3433_v45  ;;  %3227 = vmatprep.mubr.bf16.mxu0 %v4005_v62 }
  0xfb   : > { %3235 = vmatprep.mubr.bf16.mxu1 %v4053_v24 }
  0xfc   : > { %3226 = vmatpush3.bf16.msra.mxu0 %v3433_v45 }
  0xfd   : > { %3258 = vmatpush3.bf16.msra.mxu1 %v3433_v45 }
  0xff   : > { %3228 = vmatmul.mubr.bf16.vlgmr.msra.gmra.mxu0 %v4020_v4 }
 0x100   : > { %3236 = vmatmul.mubr.bf16.vlgmr.msra.gmra.mxu1 %v4069_v32  ;;  %3231 = vmatprep.mubr.bf16.mxu0 %v4029_v10 }
 0x101   : > { %3239 = vmatprep.mubr.bf16.mxu1 %v4141_v59 }
 0x107   : > { %3232 = vmatmul.mubr.bf16.gmra.mxu0 %v4044_v17 }
 0x108   : > { %3240 = vmatmul.mubr.bf16.gmra.mxu1 %v1936_v7 }
 0x13f   : > { %v2973_v8 = vpop.f32.mrf.mxu0 }
 0x140   : > { %v3005_v62 = vpop.f32.mrf.mxu1 }
 0x141   : > { %v641_v9 = vadd.f32 %v3005_v62, %v2973_v8  ;;  %v487_v11 = vpop.f32.mrf.mxu0 }
 0x142   : > { %v632_v12 = vpop.f32.mrf.mxu1 }
 0x143   : > { %v633_v13 = vadd.f32 %v632_v12, %v487_v11  ;;  %v2974_v15 = vpop.f32.mrf.mxu0 }
 0x144   : > { %v3006_v4 = vpop.f32.mrf.mxu1 }
 0x145   : > { %v644_v16 = vadd.f32 %v3006_v4, %v2974_v15  ;;  %v490_v19 = vpop.f32.mrf.mxu0 }
 0x146   : > { %v635_v20 = vpop.f32.mrf.mxu1 }
 0x147   : > { %v636_v10 = vadd.f32 %v635_v20, %v490_v19  ;;  %v2977_v22 = vpop.f32.mrf.mxu0 }
 0x148   : > { %v3009_v24 = vpop.f32.mrf.mxu1 }
 0x149   : > { %v657_v25 = vadd.f32 %v3009_v24, %v2977_v22  ;;  %v503_v26 = vpop.f32.mrf.mxu0 }
 0x14a   : > { %v648_v27 = vpop.f32.mrf.mxu1 }
 0x14b   : > { %v649_v28 = vadd.f32 %v648_v27, %v503_v26  ;;  %v2978_v17 = vpop.f32.mrf.mxu0 }
 0x14c   : > { %v3010_v29 = vpop.f32.mrf.mxu1 }
 0x14d   : > { %v660_v30 = vadd.f32 %v3010_v29, %v2978_v17  ;;  %v506_v32 = vpop.f32.mrf.mxu0 }
 0x14e   : > { %v651_v34 = vpop.f32.mrf.mxu1 }
 0x14f   : > { %v652_v35 = vadd.f32 %v651_v34, %v506_v32  ;;  %v2981_v36 = vpop.f32.mrf.mxu0 }
 0x150   : > { %v3013_v38 = vpop.f32.mrf.mxu1 }
 0x151   : > { %v673_v39 = vadd.f32 %v3013_v38, %v2981_v36  ;;  %v519_v41 = vpop.f32.mrf.mxu0 }
 0x152   : > { %v664_v42 = vpop.f32.mrf.mxu1 }
 0x153   : > { %v665_v61 = vadd.f32 %v664_v42, %v519_v41  ;;  %v2982_v43 = vpop.f32.mrf.mxu0 }
 0x154   : > { %v3014_v44 = vpop.f32.mrf.mxu1 }
 0x155   : > { %v676_v46 = vadd.f32 %v3014_v44, %v2982_v43  ;;  %v522_v47 = vpop.f32.mrf.mxu0 }
 0x156   : > { %v667_v49 = vpop.f32.mrf.mxu1 }
 0x157   : > { %v668_v50 = vadd.f32 %v667_v49, %v522_v47  ;;  %v2985_v51 = vpop.f32.mrf.mxu0 }
 0x158   : > { %v3017_v52 = vpop.f32.mrf.mxu1 }
 0x159   : > { %v689_v53 = vadd.f32 %v3017_v52, %v2985_v51  ;;  %v535_v54 = vpop.f32.mrf.mxu0 }
 0x15a   : > { %v680_v55 = vpop.f32.mrf.mxu1 }
 0x15b   : > { %v681_v56 = vadd.f32 %v680_v55, %v535_v54  ;;  %v2986_v57 = vpop.f32.mrf.mxu0 }
 0x15c   : > { %v3018_v58 = vpop.f32.mrf.mxu1 }
 0x15d   : > { %v692_v59 = vadd.f32 %v3018_v58, %v2986_v57  ;;  %v538_v60 = vpop.f32.mrf.mxu0 }
 0x15e   : > { %v683_v63 = vpop.f32.mrf.mxu1 }
 0x15f   : > { %v684_v0 = vadd.f32 %v683_v63, %v538_v60  ;;  %v3037_v1 = vpop.f32.mrf.mxu0 }
 0x160   : > { %v883_v6 = vadd.f32 %v3037_v1, %v641_v9  ;;  %v3069_v5 = vpop.f32.mrf.mxu1 }
 0x161   : > { %v818_v14 = vpop.f32.mrf.mxu0 }
 0x162   : > { %v4200_v18 = vadd.f32 %v3069_v5, %v883_v6  ;;  %v881_v21 = vadd.f32 %v818_v14, %v633_v13  ;;  %v1023_v23 = vpop.f32.mrf.mxu1 }
 0x163   : > { %v3038_v31 = vpop.f32.mrf.mxu0 }
 0x164   : > { %v4202_v33 = vadd.f32 %v1023_v23, %v881_v21  ;;  %v884_v37 = vadd.f32 %v3038_v31, %v644_v16  ;;  %v3070_v40 = vpop.f32.mrf.mxu1 }
 0x165   : > { %v821_v48 = vpop.f32.mrf.mxu0 }
 0x166   : > { %v4204_v45 = vadd.f32 %v3070_v40, %v884_v37  ;;  %v882_v2 = vadd.f32 %v821_v48, %v636_v10  ;;  %v1026_v3 = vpop.f32.mrf.mxu1 }
 0x167   : > { %v3041_v7 = vpop.f32.mrf.mxu0 }
 0x168   : > { %v4206_v8 = vadd.f32 %v1026_v3, %v882_v2  ;;  %v887_v62 = vadd.f32 %v3041_v7, %v657_v25  ;;  %v3073_v9 = vpop.f32.mrf.mxu1 }
 0x169   : > { %v834_v11 = vpop.f32.mrf.mxu0 }
 0x16a   : > { %v4208_v12 = vadd.f32 %v3073_v9, %v887_v62  ;;  %v885_v13 = vadd.f32 %v834_v11, %v649_v28  ;;  %v1039_v15 = vpop.f32.mrf.mxu1 }
 0x16b   : > { %v3042_v4 = vpop.f32.mrf.mxu0 }
 0x16c   : > { %v4210_v19 = vadd.f32 %v1039_v15, %v885_v13  ;;  %v888_v16 = vadd.f32 %v3042_v4, %v660_v30  ;;  %v3074_v20 = vpop.f32.mrf.mxu1 }
 0x16d   : > { %v837_v22 = vpop.f32.mrf.mxu0 }
 0x16e   : > { %v4212_v24 = vadd.f32 %v3074_v20, %v888_v16  ;;  %v886_v10 = vadd.f32 %v837_v22, %v652_v35  ;;  %v1042_v26 = vpop.f32.mrf.mxu1 }
 0x16f   : > { %v3045_v27 = vpop.f32.mrf.mxu0 }
 0x170   : > { %v4214_v17 = vadd.f32 %v1042_v26, %v886_v10  ;;  %v891_v25 = vadd.f32 %v3045_v27, %v673_v39  ;;  %v3077_v29 = vpop.f32.mrf.mxu1 }
 0x171   : > { %v850_v32 = vpop.f32.mrf.mxu0 }
 0x172   : > { %v4216_v34 = vadd.f32 %v3077_v29, %v891_v25  ;;  %v889_v28 = vadd.f32 %v850_v32, %v665_v61  ;;  %v1055_v36 = vpop.f32.mrf.mxu1 }
 0x173   : > { %v3046_v38 = vpop.f32.mrf.mxu0 }
 0x174   : > { %v4218_v41 = vadd.f32 %v1055_v36, %v889_v28  ;;  %v892_v30 = vadd.f32 %v3046_v38, %v676_v46  ;;  %v3078_v42 = vpop.f32.mrf.mxu1 }
 0x175   : > { %v853_v43 = vpop.f32.mrf.mxu0 }
 0x176   : > { %v4220_v44 = vadd.f32 %v3078_v42, %v892_v30  ;;  %v890_v35 = vadd.f32 %v853_v43, %v668_v50  ;;  %v1058_v47 = vpop.f32.mrf.mxu1 }
 0x177   : > { %v3049_v49 = vpop.f32.mrf.mxu0 }
 0x178   : > { %v4222_v51 = vadd.f32 %v1058_v47, %v890_v35  ;;  %v895_v39 = vadd.f32 %v3049_v49, %v689_v53  ;;  %v3081_v52 = vpop.f32.mrf.mxu1 }
 0x179   : > { %v866_v54 = vpop.f32.mrf.mxu0 }
 0x17a   : > { %v4224_v55 = vadd.f32 %v3081_v52, %v895_v39  ;;  %v893_v61 = vadd.f32 %v866_v54, %v681_v56  ;;  %v1071_v57 = vpop.f32.mrf.mxu1 }
 0x17b   : > { %v3050_v58 = vpop.f32.mrf.mxu0 }
 0x17c   : > { %v4226_v60 = vadd.f32 %v1071_v57, %v893_v61  ;;  %v896_v46 = vadd.f32 %v3050_v58, %v692_v59  ;;  %v3082_v63 = vpop.f32.mrf.mxu1 }
 0x17d   : > { %v869_v1 = vpop.f32.mrf.mxu0 }
 0x17e   : > { %v4228_v6 = vadd.f32 %v3082_v63, %v896_v46  ;;  %v894_v50 = vadd.f32 %v869_v1, %v684_v0  ;;  %v1074_v5 = vpop.f32.mrf.mxu1 }
 0x17f   : > { %v3101_v14 = vpop.f32.mrf.mxu0 }
 0x180   : > { %v4230_v21 = vadd.f32 %v1074_v5, %v894_v50  ;;  %v4232_v53 = vpop.f32.mrf.mxu1 }
 0x181   : > { %v1225_v23 = vpop.f32.mrf.mxu0 }
 0x182   : > { %v4234_v31 = vpop.f32.mrf.mxu1 }
 0x183   : > { %v3102_v56 = vpop.f32.mrf.mxu0 }
 0x184   : > { %v4236_v37 = vpop.f32.mrf.mxu1 }
 0x185   : > { %v1228_v40 = vpop.f32.mrf.mxu0 }
 0x186   : > { %v4238_v48 = vpop.f32.mrf.mxu1 }
 0x187   : > { %v3105_v59 = vpop.f32.mrf.mxu0 }
 0x188   : > { %v4240_v2 = vpop.f32.mrf.mxu1 }
 0x189   : > { %v1241_v3 = vpop.f32.mrf.mxu0 }
 0x18a   : > { %v4242_v0 = vpop.f32.mrf.mxu1 }
 0x18b   : > { %v4244_v7 = vpop.f32.mrf.mxu0 }
 0x18c   : > { %v4246_v62 = vpop.f32.mrf.mxu1 }
 0x18d   : > { %v4248_v9 = vpop.f32.mrf.mxu0 }
 0x18e   : > { %v4250_v11 = vpop.f32.mrf.mxu1 }
 0x18f   : > { %4518 = vst [vmem:[#allocation12_spill] sm:$0xff] %v4250_v11  ;;  %v3109_v13 = vpop.f32.mrf.mxu0 }
 0x190   : > { %v3141_v15 = vpop.f32.mrf.mxu1 }
 0x191   : > { %v1257_v4 = vpop.f32.mrf.mxu0 }
 0x192   : > { %v1459_v16 = vpop.f32.mrf.mxu1 }
 0x193   : > { %v3110_v20 = vpop.f32.mrf.mxu0 }
 0x194   : > { %v4252_v22 = vpop.f32.mrf.mxu1 }
 0x195   : > { %v1260_v10 = vpop.f32.mrf.mxu0 }
 0x196   : > { %v1462_v26 = vpop.f32.mrf.mxu1 }
 0x197   : > { %v3113_v27 = vpop.f32.mrf.mxu0 }
 0x198   : > { %v4254_v25 = vpop.f32.mrf.mxu1 }
 0x199   : > { %4519 = vst [vmem:[#allocation13_spill] sm:$0xff] %v4254_v25  ;;  %v1273_v29 = vpop.f32.mrf.mxu0 }
 0x19a   : > { %v4256_v32 = vpop.f32.mrf.mxu1 }
 0x19b   : > { %4520 = vst [vmem:[#allocation14_spill] sm:$0xff] %v4256_v32  ;;  %v3114_v28 = vpop.f32.mrf.mxu0 }
 0x19c   : > { %v4258_v36 = vpop.f32.mrf.mxu1 }
 0x19d   : > { %4521 = vst [vmem:[#allocation15_spill] sm:$0xff] %v4258_v36  ;;  %v1276_v38 = vpop.f32.mrf.mxu0 }
 0x19e   : > { %v4260_v30 = vpop.f32.mrf.mxu1 }
 0x19f   : > { %4522 = vst [vmem:[#allocation16_spill] sm:$0xff] %v4260_v30  ;;  %v3165_v42 = vpop.f32.mrf.mxu0 }
 0x1a0   : > { %v4262_v43 = vpop.f32.mrf.mxu1 }
 0x1a1   : > { %4523 = vst [vmem:[#allocation17_spill] sm:$0xff] %v4262_v43  ;;  %v1632_v35 = vpop.f32.mrf.mxu0 }
 0x1a2   : > { %v4264_v47 = vpop.f32.mrf.mxu1 }
 0x1a3   : > { %4524 = vst [vmem:[#allocation18_spill] sm:$0xff] %v4264_v47  ;;  %v3166_v49 = vpop.f32.mrf.mxu0 }
 0x1a4   : > { %v4266_v39 = vpop.f32.mrf.mxu1 }
 0x1a5   : > { %4525 = vst [vmem:[#allocation19_spill] sm:$0xff] %v4266_v39  ;;  %v1635_v52 = vpop.f32.mrf.mxu0 }
 0x1a6   : > { %v4268_v54 = vpop.f32.mrf.mxu1 }
 0x1a7   : > { %4526 = vst [vmem:[#allocation20_spill] sm:$0xff] %v4268_v54  ;;  %v3169_v61 = vpop.f32.mrf.mxu0 }
 0x1a8   : > { %v4270_v57 = vpop.f32.mrf.mxu1 }
 0x1a9   : > { %4527 = vst [vmem:[#allocation21_spill] sm:$0xff] %v4270_v57  ;;  %v1648_v58 = vpop.f32.mrf.mxu0 }
 0x1aa   : > { %v4272_v46 = vpop.f32.mrf.mxu1 }
 0x1ab   : > { %4528 = vst [vmem:[#allocation22_spill] sm:$0xff] %v4272_v46  ;;  %v4274_v63 = vpop.f32.mrf.mxu0  ;;  %v1290_v46 = vadd.f32 %v3101_v14, %v4200_v18  ;;  %v1299_v18 = vadd.f32 %v3110_v20, %v4220_v44  ;;  %v1295_v44 = vadd.f32 %v4244_v7, %v4212_v24 }
 0x1ac   : > { %4529 = vst [vmem:[#allocation23_spill] sm:$0xff] %v4274_v63  ;;  %v4276_v1 = vpop.f32.mrf.mxu1  ;;  %v1288_v63 = vadd.f32 %v1225_v23, %v4202_v33  ;;  %v1297_v33 = vadd.f32 %v1260_v10, %v4222_v51  ;;  %v1293_v51 = vadd.f32 %v4248_v9, %v4214_v17 }
 0x1ad   : > { %4530 = vst [vmem:[#allocation24_spill] sm:$0xff] %v4276_v1  ;;  %v4278_v50 = vpop.f32.mrf.mxu0  ;;  %v1291_v1 = vadd.f32 %v3102_v56, %v4204_v45  ;;  %v1497_v10 = vadd.f32 %v4246_v62, %v1295_v44 }
 0x1ae   : > { %4531 = vst [vmem:[#allocation25_spill] sm:$0xff] %v4278_v50  ;;  %v4280_v5 = vpop.f32.mrf.mxu1  ;;  %v1289_v50 = vadd.f32 %v1228_v40, %v4206_v8  ;;  %v1492_v8 = vadd.f32 %v4232_v53, %v1290_v46  ;;  %v4544_v46 = vld [vmem:[#allocation20_spill] sm:$0xff] }
 0x1af   : > { %4532 = vst [vmem:[#allocation26_spill] sm:$0xff] %v4280_v5  ;;  %v3173_v47 = vpop.f32.mrf.mxu0  ;;  %v1294_v5 = vadd.f32 %v3105_v59, %v4208_v12  ;;  %v1490_v12 = vadd.f32 %v4234_v31, %v1288_v63  ;;  %v1302_v31 = vadd.f32 %v3113_v27, %v4224_v55  ;;  %v1501_v59 = vadd.f32 %v4252_v22, %v1299_v18  ;;  %v4536_v22 = vld [vmem:[#allocation12_spill] sm:$0xff]  ;;  %v4537_v27 = vld [vmem:[#allocation13_spill] sm:$0xff] }
 0x1b0   : > { %v4282_v43 = vpop.f32.mrf.mxu1  ;;  %v1491_v14 = vadd.f32 %v4238_v48, %v1289_v50  ;;  %v1697_v7 = vadd.f32 %v3165_v42, %v1492_v8  ;;  %v4545_v50 = vld [vmem:[#allocation21_spill] sm:$0xff] }
 0x1b1   : > { %4533 = vst [vmem:[#allocation27_spill] sm:$0xff] %v4282_v43  ;;  %v1664_v39 = vpop.f32.mrf.mxu0  ;;  %v1292_v43 = vadd.f32 %v1241_v3, %v4210_v19  ;;  %v1493_v19 = vadd.f32 %v4236_v37, %v1291_v1  ;;  %v1300_v37 = vadd.f32 %v1273_v29, %v4226_v60  ;;  %v1303_v3 = vadd.f32 %v3114_v28, %v4228_v6  ;;  %v4538_v29 = vld [vmem:[#allocation14_spill] sm:$0xff] }
 0x1b2   : > { %v4284_v30 = vpop.f32.mrf.mxu1  ;;  %v1696_v9 = vadd.f32 %v1635_v52, %v1491_v14  ;;  %v1504_v6 = vadd.f32 %v4537_v27, %v1302_v31  ;;  %v4541_v52 = vld [vmem:[#allocation17_spill] sm:$0xff]  ;;  %v4546_v18 = vld [vmem:[#allocation22_spill] sm:$0xff] }
 0x1b3   : > { %4534 = vst [vmem:[#allocation28_spill] sm:$0xff] %v4284_v30  ;;  %v3174_v54 = vpop.f32.mrf.mxu0  ;;  %v1298_v30 = vadd.f32 %v3109_v13, %v4216_v34  ;;  %v1496_v34 = vadd.f32 %v4240_v2, %v1294_v5  ;;  %v1499_v2 = vadd.f32 %v1462_v26, %v1297_v33  ;;  %v1695_v13 = vadd.f32 %v1632_v35, %v1490_v12 }
 0x1b4   : > { %v4286_v36 = vpop.f32.mrf.mxu1  ;;  %v1698_v17 = vadd.f32 %v3166_v49, %v1493_v19  ;;  %v1706_v60 = vadd.f32 %v3174_v54, %v1501_v59  ;;  %v1495_v26 = vadd.f32 %v4536_v22, %v1293_v51  ;;  %v4542_v54 = vld [vmem:[#allocation18_spill] sm:$0xff]  ;;  %v1898_v63 = vadd.f32 %v4544_v46, %v1696_v9 }
 0x1b5   : > { %4535 = vst [vmem:[#allocation29_spill] sm:$0xff] %v4286_v36  ;;  %v1667_v57 = vpop.f32.mrf.mxu0  ;;  %v1296_v36 = vadd.f32 %v1257_v4, %v4218_v41  ;;  %v1494_v41 = vadd.f32 %v4242_v0, %v1292_v43  ;;  %v1500_v53 = vadd.f32 %v3141_v15, %v1298_v30  ;;  %v1301_v0 = vadd.f32 %v1276_v38, %v4230_v21  ;;  %v4540_v30 = vld [vmem:[#allocation16_spill] sm:$0xff] }
 0x1b6   : > { %v4292_v32 = vpop.f32.mrf.mxu1  ;;  %v1701_v4 = vadd.f32 %v3169_v61, %v1496_v34  ;;  %v1502_v21 = vadd.f32 %v4538_v29, %v1300_v37  ;;  %v1704_v35 = vadd.f32 %v1667_v57, %v1499_v2  ;;  %v1897_v61 = vadd.f32 %v4542_v54, %v1695_v13  ;;  %v4549_v57 = vld [vmem:[#allocation23_spill] sm:$0xff] }
 0x1b7   : > { %v4296_v25 = vpop.f32.mrf.mxu0  ;;  %v1498_v40 = vadd.f32 %v1459_v16, %v1296_v36  ;;  %v1699_v55 = vadd.f32 %v1648_v58, %v1494_v41  ;;  %v1705_v16 = vadd.f32 %v3173_v47, %v1500_v53  ;;  %v4539_v36 = vld [vmem:[#allocation15_spill] sm:$0xff]  ;;  %v1503_v42 = vadd.f32 %v4540_v30, %v1301_v0  ;;  %v4551_v0 = vld [vmem:[#allocation25_spill] sm:$0xff] }
 0x1b8   : > { %v4300_v11 = vpop.f32.mrf.mxu1  ;;  %v1505_v38 = vadd.f32 %v4539_v36, %v1303_v3  ;;  %v1899_v47 = vadd.f32 %v4541_v52, %v1697_v7  ;;  %v4543_v58 = vld [vmem:[#allocation19_spill] sm:$0xff]  ;;  %v1903_v5 = vadd.f32 %v4545_v50, %v1701_v4  ;;  %v1702_v34 = vadd.f32 %v4549_v57, %v1497_v10 }
 0x1b9   : > { %v4304_v45 = vpop.f32.mrf.mxu0  ;;  %v1703_v43 = vadd.f32 %v1664_v39, %v1498_v40  ;;  %v1900_v62 = vadd.f32 %v4543_v58, %v1698_v17  ;;  %v1901_v33 = vadd.f32 %v4546_v18, %v1699_v55  ;;  %v4547_v8 = vld [vmem:[#allocation27_spill] sm:$0xff]  ;;  %v1906_v37 = vadd.f32 %v4292_v32, %v1704_v35 }
 0x1ba   : > { %v4310_v23 = vpop.f32.mrf.mxu1  ;;  %v1907_v12 = vadd.f32 %v4547_v8, %v1705_v16  ;;  %v4550_v40 = vld [vmem:[#allocation28_spill] sm:$0xff]  ;;  %v1700_v7 = vadd.f32 %v4551_v0, %v1495_v26  ;;  %v1709_v13 = vadd.f32 %v4296_v25, %v1504_v6  ;;  %v1707_v29 = vadd.f32 %v4304_v45, %v1502_v21 }
 0x1bb   : > { %v3178_v56 = vpop.f32.mrf.mxu0  ;;  %v1905_v31 = vadd.f32 %v4550_v40, %v1703_v43  ;;  %v4552_v6 = vld [vmem:[#allocation24_spill] sm:$0xff] }
 0x1bc   : > { %v4320_v48 = vpop.f32.mrf.mxu1  ;;  %v4548_v19 = vld [vmem:[#allocation29_spill] sm:$0xff]  ;;  %v1710_v55 = vadd.f32 %v3178_v56, %v1505_v38  ;;  %v1904_v56 = vadd.f32 %v4552_v6, %v1702_v34 }
 0x1bd   : > { %v1683_v24 = vpop.f32.mrf.mxu0  ;;  %v1908_v14 = vadd.f32 %v4548_v19, %v1706_v60 }
 0x1be   : > { %v4325_v15 = vpop.f32.mrf.mxu1  ;;  %v1912_v58 = vadd.f32 %v4320_v48, %v1710_v55 }
 0x1bf   : > { %v3229_v20 = vpop.f32.mrf.mxu0 }
 0x1c0   : > { %v3237_v28 = vpop.f32.mrf.mxu1  ;;  %v2101_v41 = vadd.f32 %v3229_v20, %v1899_v47  ;;  %v4553_v47 = vld [vmem:[#allocation26_spill] sm:$0xff] }
 0x1c1   : > { %v2036_v49 = vpop.f32.mrf.mxu0  ;;  %v4344_v59 = vadd.f32 %v3237_v28, %v1907_v12  ;;  %v1708_v28 = vadd.f32 %v1683_v24, %v1503_v42  ;;  %v1902_v54 = vadd.f32 %v4553_v47, %v1700_v7 }
 0x1c2   : > { %v2068_v1 = vpop.f32.mrf.mxu1  ;;  %v2099_v44 = vadd.f32 %v2036_v49, %v1897_v61  ;;  %v2222_v30 = vmul.f32 %v2101_v41, %v2101_v41  ;;  %v1911_v61 = vadd.f32 %v4300_v11, %v1709_v13 }
 0x1c3   : > { %v3230_v39 = vpop.f32.mrf.mxu0  ;;  %v4350_v16 = vadd.f32 %v2068_v1, %v1905_v31  ;;  %v1909_v1 = vadd.f32 %v4310_v23, %v1707_v29  ;;  %v1910_v50 = vadd.f32 %v4325_v15, %v1708_v28 }
 0x1c4   : > { %v2102_v51 = vadd.f32 %v3230_v39, %v1900_v62  ;;  %v3238_v53 = vpop.f32.mrf.mxu1  ;;  %v2220_v10 = vmul.f32 %v2099_v44, %v2099_v44 }
 0x1c5   : > { %v4346_v2 = vadd.f32 %v3238_v53, %v1908_v14  ;;  %v2039_v3 = vpop.f32.mrf.mxu0 }
 0x1c6   : > { %v2772_v17 = vpack.c.bf16 %v2102_v51, %v2101_v41  ;;  %v2100_v9 = vadd.f32 %v2039_v3, %v1898_v63  ;;  %v2071_v4 = vpop.f32.mrf.mxu1  ;;  %v2223_v45 = vmul.f32 %v2102_v51, %v2102_v51 }
 0x1c7   : > { %v2792_v32 = vpack.c.bf16 %v4346_v2, %v4344_v59  ;;  %v4354_v60 = vadd.f32 %v2071_v4, %v1906_v37  ;;  %v3233_v20 = vpop.f32.mrf.mxu0 }
 0x1c8   : > { %2804 = vst [vmem:[%s3738_s25 + $0x8] sm:$0xff] %v2772_v17   ;;  %v2767_v22 = vpack.c.bf16 %v2100_v9, %v2099_v44  ;;  %v2196_v26 = vadd.f32 %v2100_v9, %v2099_v44  ;;  %v2221_v25 = vmul.f32 %v2100_v9, %v2100_v9  ;;  %v3241_v27 = vpop.f32.mrf.mxu1  ;;  %v2105_v42 = vadd.f32 %v3233_v20, %v1903_v5 }
 0x1c9   : > { %2808 = vst [vmem:[%s3738_s25 + $0x28] sm:$0xff] %v2792_v32   ;;  %v2787_v36 = vpack.c.bf16 %v4354_v60, %v4350_v16  ;;  %v2052_v38 = vpop.f32.mrf.mxu0  ;;  %v4373_v11 = vadd.f32 %v3241_v27, %v1911_v61 }
 0x1ca   : > { %2768 = vst [vmem:[%s3738_s25] sm:$0xff] %v2767_v22   ;;  %v2197_v43 = vadd.f32 %v2196_v26, %v2101_v41  ;;  %v2236_v35 = vadd.f32 %v2221_v25, %v2220_v10  ;;  %v2103_v49 = vadd.f32 %v2052_v38, %v1901_v33  ;;  %v2084_v52 = vpop.f32.mrf.mxu1  ;;  %v2226_v53 = vmul.f32 %v2105_v42, %v2105_v42 }
 0x1cb   : > { %2807 = vst [vmem:[%s3738_s25 + $0x20] sm:$0xff] %v2787_v36   ;;  %v3234_v24 = vpop.f32.mrf.mxu0  ;;  %v2111_v14 = vadd.f32 %v2084_v52, %v1909_v1 }
 0x1cc   : > { %v2237_v21 = vadd.f32 %v2236_v35, %v2222_v30  ;;  %v2198_v62 = vadd.f32 %v2197_v43, %v2102_v51  ;;  %v2106_v46 = vadd.f32 %v3234_v24, %v1904_v56  ;;  %v3242_v63 = vpop.f32.mrf.mxu1  ;;  %v2224_v8 = vmul.f32 %v2103_v49, %v2103_v49 }
 0x1cd   : > { %v4375_v18 = vadd.f32 %v3242_v63, %v1912_v58  ;;  %v2055_v48 = vpop.f32.mrf.mxu0 }
 0x1ce   : > { %v2199_v33 = vadd.f32 %v2198_v62, %v2103_v49  ;;  %v2238_v12 = vadd.f32 %v2237_v21, %v2223_v45  ;;  %v2782_v19 = vpack.c.bf16 %v2106_v46, %v2105_v42  ;;  %v2087_v5 = vpop.f32.mrf.mxu1  ;;  %v2104_v15 = vadd.f32 %v2055_v48, %v1902_v54 }
 0x1cf   : > { %v2802_v23 = vpack.c.bf16 %v4375_v18, %v4373_v11  ;;  %v2112_v39 = vadd.f32 %v2087_v5, %v1910_v50 }
 0x1d0   : > { %v2239_v57 = vadd.f32 %v2238_v12, %v2224_v8  ;;  %2806 = vst [vmem:[%s3738_s25 + $0x18] sm:$0xff] %v2782_v19   ;;  %v2777_v34 = vpack.c.bf16 %v2104_v15, %v2103_v49  ;;  %v2200_v41 = vadd.f32 %v2199_v33, %v2104_v15  ;;  %v2225_v44 = vmul.f32 %v2104_v15, %v2104_v15 }
 0x1d1   : > { %2810 = vst [vmem:[%s3738_s25 + $0x38] sm:$0xff] %v2802_v23   ;;  %v2797_v51 = vpack.c.bf16 %v2112_v39, %v2111_v14 }
 0x1d2   : > { %2805 = vst [vmem:[%s3738_s25 + $0x10] sm:$0xff] %v2777_v34   ;;  %v2201_v40 = vadd.f32 %v2200_v41, %v2105_v42  ;;  %v2240_v31 = vadd.f32 %v2239_v57, %v2225_v44 }
 0x1d3   : > { %2809 = vst [vmem:[%s3738_s25 + $0x30] sm:$0xff] %v2797_v51  }
 0x1d4   : > { %3447 = shalt.err (!%p3444_p1)
}
 0x1d5   : > { %s3448_s25 = scalar_lea.hbm %s4388_s8, 1024  ;;  %s3452_s26 = scalar_lea.hbm %s4500_s2, 4096 }
 0x1d6   : > { %p3449_p4 = scmp.ne.s32.totalorder %s4388_s8, %s3448_s25  ;;  %p3453_p6 = scmp.lt.s32.totalorder %s4388_s8, %s4500_s2 }
 0x1d7   : > { %p3454_p8 = scmp.lt.s32.totalorder %s3452_s26, %s3448_s25 }
 0x1d8   : > { %p3450_p2 = pnand %p3449_p4, %p3680_p3 }
 0x1d9   : > { %p3455_p9 = por %p3454_p8, %p3453_p6 }
 0x1da   : > { %p3451_p5 = pneg %p3450_p2 }
 0x1dc   : > { %p3456_p10 = pnand %p3455_p9, %p3451_p5 }
 0x1de   : > { %3459 = shalt.err (!%p3456_p10)
}
 0x1df   : > { %s3584_s28 = smov 64   ;;  %s3585_s18 = smov 4   ;;  %v2227_v37 = vmul.f32 %v2106_v46, %v2106_v46  ;;  %v2202_v3 = vadd.f32 %v2201_v40, %v2106_v46  ;;  %v2241_v0 = vadd.f32 %v2240_v31, %v2226_v53  ;;  %v2228_v7 = vmul.f32 %v4350_v16, %v4350_v16  ;;  %v2195_v21 = vld [vmem:[%s3740_s21] sm:$0x1]  ;;  %v2219_v46 = vld [vmem:[%s3740_s21 + $0x1] sm:$0x1] }
 0x1e0   : > { %3259 = dma.vmem_to_hbm [thread:$0]  (%p3680_p3), %s4382_s29, 1024, %s4388_s8, %s4394_s27, %s3584_s28, %s3584_s28, %s3585_s18   ;;  %v2229_v9 = vmul.f32 %v4354_v60, %v4354_v60  ;;  %v2230_v32 = vmul.f32 %v4344_v59, %v4344_v59  ;;  %v2231_v22 = vmul.f32 %v4346_v2, %v4346_v2  ;;  %v2233_v29 = vmul.f32 %v2112_v39, %v2112_v39 }
 0x1e1   : > { %v2203_v13 = vadd.f32 %v2202_v3, %v4350_v16  ;;  %v2242_v17 = vadd.f32 %v2241_v0, %v2227_v37  ;;  %v2232_v16 = vmul.f32 %v2111_v14, %v2111_v14  ;;  %v2235_v38 = vmul.f32 %v4375_v18, %v4375_v18  ;;  %s2744_s0 = sshll.u32 %s3568_s19, 7  ;;  %s2296_s30 = sshll.u32 %s3740_s21, 4  ;;  %s2297_s30 = int_to_ptr.vmem [resolvable:$true] %s2296_s30 }
 0x1e2   : > { %s2294_s27 = scalar_lea.hbm %s4501_s3, %s2744_s0  ;;  %s4555_s5 = sand.u32 1, %s3544_s13  }
 0x1e3   : > { %v2243_v4 = vadd.f32 %v2242_v17, %v2228_v7  ;;  %v2204_v55 = vadd.f32 %v2203_v13, %v4354_v60  ;;  %v2234_v60 = vmul.f32 %v4373_v11, %v4373_v11  ;;  %s2265_s25 = scalar_lea.sflag [#allocation6], %s4555_s5  ;;  %s3460_s4 = scalar_lea.vmem %s2297_s30, 128 }
 0x1e4   : > { %p3461_p3 = scmp.ne.s32.totalorder %s2297_s30, %s3460_s4  ;;  %s3586_s7 = smov [#allocation5]  }
 0x1e5   : > { %v2205_v20 = vadd.f32 %v2204_v55, %v4344_v59  ;;  %v2244_v10 = vadd.f32 %v2243_v4, %v2229_v9  ;;  %s3464_s19 = sshll.u32 %s3586_s7, 4  ;;  %s3465_s19 = int_to_ptr.vmem [resolvable:$false] %s3464_s19 }
 0x1e6   : > { %p3462_p11 = pnand %p3461_p3, %p3707_p12  ;;  %s3466_s26 = scalar_lea.vmem %s3465_s19, 256 }
 0x1e7   : > { %v2206_v26 = vadd.f32 %v2205_v20, %v4346_v2  ;;  %v2245_v25 = vadd.f32 %v2244_v10, %v2230_v32  ;;  %p3467_p1 = scmp.lt.s32.totalorder %s2297_s30, %s3465_s19  ;;  %p3468_p4 = scmp.lt.s32.totalorder %s3466_s26, %s3460_s4 }
 0x1e8   : > { %p3463_p0 = pneg %p3462_p11 }
 0x1e9   : > { %v2207_v27 = vadd.f32 %v2206_v26, %v2111_v14  ;;  %v2246_v6 = vadd.f32 %v2245_v25, %v2231_v22  ;;  %p3469_p2 = por %p3468_p4, %p3467_p1 }
 0x1eb   : > { %v2208_v56 = vadd.f32 %v2207_v27, %v2112_v39  ;;  %v2247_v28 = vadd.f32 %v2246_v6, %v2232_v16  ;;  %p3470_p5 = pnand %p3469_p2, %p3463_p0 }
 0x1ed   : > { %v2209_v36 = vadd.f32 %v2208_v56, %v4373_v11  ;;  %v2248_v59 = vadd.f32 %v2247_v28, %v2233_v29 }
 0x1ef   : > { %v2210_v2 = vadd.f32 %v2209_v36, %v4375_v18  ;;  %v2249_v30 = vadd.f32 %v2248_v59, %v2234_v60 }
 0x1f1   : > { %v2211_v43 = vrot.slane %v2210_v2, 4  ;;  %v2250_v35 = vadd.f32 %v2249_v30, %v2235_v38 }
 0x1f3   : > { %v2212_v49 = vadd.f32 %v2211_v43, %v2210_v2  ;;  %v2251_v52 = vrot.slane %v2250_v35, 4 }
 0x1f5   : > { %v2213_v47 = vrot.slane %v2212_v49, 2  ;;  %v2252_v54 = vadd.f32 %v2251_v52, %v2250_v35 }
 0x1f7   : > { %v2214_v61 = vadd.f32 %v2213_v47, %v2212_v49  ;;  %v2253_v58 = vrot.slane %v2252_v54, 2 }
 0x1f9   : > { %v2215_v45 = vrot.slane %v2214_v61, 1  ;;  %v2254_v24 = vadd.f32 %v2253_v58, %v2252_v54 }
 0x1fb   : > { %v2216_v42 = vadd.f32 %v2215_v45, %v2214_v61  ;;  %v2255_v62 = vrot.slane %v2254_v24, 1 }
 0x1fd   : > { %v2217_v63 = vadd.f32 %v2216_v42, %v2195_v21  ;;  %v2256_v1 = vadd.f32 %v2255_v62, %v2254_v24 }
 0x1ff   : > { %2218 = vst [vmem:[%s3740_s21] sm:$0x1] %v2217_v63  ;;  %v2257_v50 = vadd.f32 %v2256_v1, %v2219_v46 }
 0x201   : > { %2258 = vst [vmem:[%s3740_s21 + $0x1] sm:$0x1] %v2257_v50 }
 0x202   : > { %3473 = shalt.err (!%p3470_p5)
}
 0x203   : > { %s3474_s24 = scalar_lea.hbm %s2294_s27, 128  ;;  %s3478_s18 = scalar_lea.hbm %s4501_s3, 256 }
 0x204   : > { %p3475_p6 = scmp.ne.s32.totalorder %s2294_s27, %s3474_s24  ;;  %p3479_p10 = scmp.lt.s32.totalorder %s2294_s27, %s4501_s3 }
 0x205   : > { %p3480_p3 = scmp.lt.s32.totalorder %s3478_s18, %s3474_s24 }
 0x206   : > { %p3476_p8 = pnand %p3475_p6, %p3707_p12 }
 0x207   : > { %p3481_p11 = por %p3480_p3, %p3479_p10 }
 0x208   : > { %p3477_p9 = pneg %p3476_p8 }
 0x20a   : > { %p3482_p13 = pnand %p3481_p11, %p3477_p9 }
 0x20c   : > { %3485 = shalt.err (!%p3482_p13)
}
 0x20d   : > { %3260 = dma.vmem_to_hbm [thread:$0]  (%p3707_p12), %s2297_s30, 128, %s2294_s27, %s2265_s25  }
 0x20e PF: > { %p3270_p0 = scmp.ge.s32.totalorder %s3580_s22, 2  ;;  %s2308_s8 = sand.u32 1, %s3552_s15  }
 0x20f   : > { %s2309_s5 = scalar_lea.sflag [#allocation4], %s2308_s8 }
 0x210   : > { %p3264_p1 = pnand %p3270_p0, %p3695_p7 }
 0x212   : > { %p3265_p4 = pneg %p3264_p1 }
 0x214   : > { %3531 = dma.done.wait (%p3265_p4), %s2309_s5, 1024  }
 0x215   : > { %3533 = vsyncadd (%p3265_p4), %s2309_s5, 4294966272  ;;  %s2317_s4 = sand.u32 1, %s3540_s12   ;;  %p4556_p2 = scmp.ne.s32.totalorder %s4516_s23, 0 }
 0x216   : > { %s2318_s9 = scalar_lea.sflag [#allocation6], %s2317_s4 }
 0x217   : > { %p3267_p13 = pnand %p3270_p0, %p4556_p2 }
 0x219   : > { %p3268_p5 = pneg %p3267_p13 }
 0x21b   : > { %3535 = dma.done.wait (%p3268_p5), %s2318_s9, 128  }
 0x21c   : > { %3537 = vsyncadd (%p3268_p5), %s2318_s9, 4294967168  ;;  %s20_s22 = sadd.s32 1, %s3580_s22   ;;  %s4557_s19 = sld [smem:[#allocation9_spill]] }
 0x21d   : > { %p17_p12 = scmp.ge.s32.totalorder %s20_s22, 6   ;;  %s4558_s6 = sld [smem:[#allocation10_spill]] }
 0x21e   : > { %s4559_s21 = sld [smem:[#allocation11_spill]]  ;;  %s4560_s12 = smov %s3544_s13 }
 0x21f   : > { %s4561_s13 = smov %s3548_s14  ;;  %s4562_s14 = smov %s3712_s10 }
 0x220   : > { %s4563_s15 = smov %s3556_s16  ;;  %s4564_s16 = smov %s3560_s17 }
 0x221   : > { %s4565_s17 = smov %s3715_s11  ;;  %s4566_s18 = smov %s3572_s20 }
 0x222   :  { %19 = sbr.rel (!%p17_p12) target bundleno = 11 (0xb), region = 96 }
 0x223   : > { %s4567_s20 = smov %s4558_s6 }
 0x227   :  { %2323 = vsyncpa [#allocation4], 1 }
 0x228   :  { %2325 = vsyncpa [#allocation4 + $0x1], 1 }
 0x229   :  { %2326 = vsyncpa [#allocation6], 1 }
 0x22a   :  { %2328 = vsyncpa [#allocation6 + $0x1], 1 }

</bundles_post_ra>
